<compile_context>
chip_gen: v7x
topology: tpu7x:2x2x1
jax: 0.10.0
libtpu: 0.0.40
codegen_flags: <defaults>
</compile_context>

<pallas_src>
import math
from functools import partial

import jax
import jax.numpy as jnp
import numpy as np
from jax.experimental import pallas as pl
from jax.experimental.pallas import tpu as pltpu

# ---------------------------------------------------------------------------
# Small, module-consistent configuration
# ---------------------------------------------------------------------------
D_MODEL = 32
BS = 2
SEQ = 8
LN_EPS = 1e-5
LANES = 128


def bias_init_with_prob(prior_prob):
    # mmdet-style: bias = -log((1 - p) / p); for p = 0.5 this is exactly 0.0
    return float(-math.log((1.0 - prior_prob) / prior_prob))


def _round_up(a, b):
    return ((a + b - 1) // b) * b


# ---------------------------------------------------------------------------
# Pallas kernel: one tile of [tm packed rows, P*c lanes]
# ---------------------------------------------------------------------------
def _gate_kernel(x1_ref, x2_ref, w1_ref, w2_ref, b_ref, avg_ref,
                 gamma_ref, beta_ref, o_ref, *, eps):
    x1 = x1_ref[...].astype(jnp.float32)          # [tm, L]   L = P*c
    x2 = x2_ref[...].astype(jnp.float32)          # [tm, L]
    L = x1.shape[1]
    hi = jax.lax.Precision.HIGHEST

    # concat([x1,x2]) @ W.T + b  ==  x1 @ W1 + x2 @ W2 + b  (block-diag packed).
    # Columns are arranged [g1 for all P samples | g2 for all P samples] so the
    # g1/g2 split below is a free, vreg-aligned slice.
    z = (jnp.dot(x1, w1_ref[...], precision=hi, preferred_element_type=jnp.float32)
         + jnp.dot(x2, w2_ref[...], precision=hi, preferred_element_type=jnp.float32)
         + b_ref[...])                            # [tm, 2L]

    # sigmoid via tanh: goes to the EUP slot instead of a VALU divide.
    gates = 0.5 * jnp.tanh(0.5 * z) + 0.5
    g1 = gates[:, :L]                             # lane-aligned with x1
    g2 = gates[:, L:]                             # lane-aligned with x2

    h = g1 * x1 + g2 * x2                         # [tm, L]

    # LayerNorm per 32-lane sample group: block-averaging matmul broadcasts the
    # per-group mean/var to every lane of its group (no layout-changing reshape).
    mu = jnp.dot(h, avg_ref[...], precision=hi, preferred_element_type=jnp.float32)
    hc = h - mu
    var = jnp.dot(hc * hc, avg_ref[...], precision=hi,
                  preferred_element_type=jnp.float32)
    inv = jax.lax.rsqrt(var + eps)                # EUP rsqrt
    o_ref[...] = ((hc * inv) * gamma_ref[...] + beta_ref[...]).astype(o_ref.dtype)


# ---------------------------------------------------------------------------
# Wrapper: packing, padding, pallas_call
# ---------------------------------------------------------------------------
def gate_forward(x1, x2, w_gate, b_gate, gamma, beta,
                 *, eps=LN_EPS, block_rows=1024):
    b, n, c = x1.shape
    M = b * n
    f32 = jnp.float32
    io_dtype = x1.dtype

    # ---- pack P samples per 128-lane row (lane-dense I/O) -------------------
    P = max(1, LANES // c)                        # samples per packed row
    L = P * c                                     # packed lane width
    # TODO(synk): if c does not divide 128 the kernel is still correct but not
    # fully lane-dense; a mixed-radix packing is not implemented here.

    Mp = pl.cdiv(M, P)                            # packed rows needed
    tm_needed = _round_up(max(Mp, 1), 8)          # f32 sublane multiple
    if tm_needed > block_rows:
        tm = block_rows                           # many grid steps
    elif Mp >= 16:
        tm = _round_up(pl.cdiv(Mp, 2), 8)         # >= 2 steps for v7x megacore
    else:
        tm = tm_needed                            # tiny problem: one step
    Mp_pad = _round_up(Mp, tm)
    M_pad = Mp_pad * P
    grid_n = Mp_pad // tm

    def pack(x):
        xf = x.reshape(M, c)
        xf = jnp.pad(xf, ((0, M_pad - M), (0, 0)))
        return xf.reshape(Mp_pad, L)              # keep input dtype

    x1p = pack(x1)
    x2p = pack(x2)

    # ---- build packed (block-diagonal) parameters ---------------------------
    # torch Linear: y = x @ W.T + b,  W: [2c, 2c].  Split W.T by input half
    # (x1 / x2) and by output half (g1 / g2).
    wT = w_gate.astype(f32).T                     # [2c_in, 2c_out]
    w1a, w1b = wT[:c, :c], wT[:c, c:]             # x1 -> g1, x1 -> g2
    w2a, w2b = wT[c:, :c], wT[c:, c:]             # x2 -> g1, x2 -> g2
    eye_p = jnp.eye(P, dtype=f32)
    w1_big = jnp.concatenate([jnp.kron(eye_p, w1a), jnp.kron(eye_p, w1b)], axis=1)
    w2_big = jnp.concatenate([jnp.kron(eye_p, w2a), jnp.kron(eye_p, w2b)], axis=1)
    b1, b2 = b_gate.astype(f32)[:c], b_gate.astype(f32)[c:]
    b_big = jnp.concatenate([jnp.tile(b1, P), jnp.tile(b2, P)]).reshape(1, 2 * L)
    avg = jnp.kron(eye_p, jnp.full((c, c), 1.0 / c, dtype=f32))      # [L, L]
    gamma_p = jnp.tile(gamma.astype(f32), P).reshape(1, L)
    beta_p = jnp.tile(beta.astype(f32), P).reshape(1, L)

    out = pl.pallas_call(
        partial(_gate_kernel, eps=eps),
        out_shape=jax.ShapeDtypeStruct((Mp_pad, L), io_dtype),
        grid_spec=pl.GridSpec(
            grid=(grid_n,),
            in_specs=[
                pl.BlockSpec((tm, L), lambda i: (i, 0)),        # x1 packed rows
                pl.BlockSpec((tm, L), lambda i: (i, 0)),        # x2 packed rows
                pl.BlockSpec((L, 2 * L), lambda i: (0, 0)),     # W1 (resident)
                pl.BlockSpec((L, 2 * L), lambda i: (0, 0)),     # W2 (resident)
                pl.BlockSpec((1, 2 * L), lambda i: (0, 0)),     # gate bias
                pl.BlockSpec((L, L), lambda i: (0, 0)),         # block-avg matrix
                pl.BlockSpec((1, L), lambda i: (0, 0)),         # LN gamma
                pl.BlockSpec((1, L), lambda i: (0, 0)),         # LN beta
            ],
            out_specs=pl.BlockSpec((tm, L), lambda i: (i, 0)),
        ),
        compiler_params=pltpu.CompilerParams(
            dimension_semantics=("parallel",)),
    )(x1p, x2p, w1_big, w2_big, b_big, avg, gamma_p, beta_p)

    return out.reshape(M_pad, c)[:M].reshape(b, n, c)


# ---------------------------------------------------------------------------
# Pure-JAX reference (same semantics as the PyTorch forward)
# ---------------------------------------------------------------------------
def gate_reference(x1, x2, w_gate, b_gate, gamma, beta, eps=LN_EPS):
    b, n, c = x1.shape
    gi = jnp.concatenate([x1, x2], axis=-1)                      # [b, n, 2c]
    z = jnp.dot(gi, w_gate.T, precision=jax.lax.Precision.HIGHEST) + b_gate
    gates = jax.nn.sigmoid(z)
    g1 = gates[..., :c]
    g2 = gates[..., c:]
    h = g1 * x1 + g2 * x2
    mu = jnp.mean(h, axis=-1, keepdims=True)
    var = jnp.mean((h - mu) ** 2, axis=-1, keepdims=True)
    return (h - mu) * jax.lax.rsqrt(var + eps) * gamma + beta


# ---------------------------------------------------------------------------
# Deterministic parameter init (shapes from the module __init__)
# ---------------------------------------------------------------------------
def init_params(key, d_model):
    kw, kg, kb = jax.random.split(key, 3)
    # NOTE: the module zero-inits gate.weight (so gates == sigmoid(bias));
    # small deterministic random weights are used instead so the in-kernel
    # matmul / sigmoid / LayerNorm path is non-trivial for the numerical check.
    w_gate = 0.1 * jax.random.normal(kw, (2 * d_model, 2 * d_model), jnp.float32)
    b_gate = jnp.full((2 * d_model,), bias_init_with_prob(0.5), jnp.float32)
    gamma = 1.0 + 0.1 * jax.random.normal(kg, (d_model,), jnp.float32)
    beta = 0.1 * jax.random.normal(kb, (d_model,), jnp.float32)
    return w_gate, b_gate, gamma, beta


if __name__ == "__main__":
    key = jax.random.PRNGKey(0)
    k1, k2, kp = jax.random.split(key, 3)
    x1 = jax.random.normal(k1, (BS, SEQ, D_MODEL), jnp.float32)
    x2 = jax.random.normal(k2, (BS, SEQ, D_MODEL), jnp.float32)
    w_gate, b_gate, gamma, beta = init_params(kp, D_MODEL)

    out = gate_forward(x1, x2, w_gate, b_gate, gamma, beta)
    out = jax.block_until_ready(out)

    ref = gate_reference(x1, x2, w_gate, b_gate, gamma, beta)
    np.testing.assert_allclose(np.asarray(out), np.asarray(ref),
                               rtol=1e-3, atol=1e-3)
    print("KERNEL_OK")
</pallas_src>

<mosaic_0001>
module attributes {stable_mosaic.version = 11 : i64} {
  func.func @_gate_kernel(%arg0: i32, %arg1: memref<8x128xf32, #tpu.memory_space<vmem>>, %arg2: memref<8x128xf32, #tpu.memory_space<vmem>>, %arg3: memref<128x256xf32, #tpu.memory_space<vmem>>, %arg4: memref<128x256xf32, #tpu.memory_space<vmem>>, %arg5: memref<1x256xf32, #tpu.memory_space<vmem>>, %arg6: memref<128x128xf32, #tpu.memory_space<vmem>>, %arg7: memref<1x128xf32, #tpu.memory_space<vmem>>, %arg8: memref<1x128xf32, #tpu.memory_space<vmem>>, %arg9: memref<8x128xf32, #tpu.memory_space<vmem>>) attributes {dimension_semantics = [#tpu.dimension_semantics<parallel>], iteration_bounds = array<i64: 1>, scalar_prefetch = 0 : i64, scratch_operands = 0 : i64, tpu.core_type = #tpu.core_type<tc>, window_params = [{transform_indices = @transform_0, window_bounds = array<i64: 8, 128>}, {transform_indices = @transform_1, window_bounds = array<i64: 8, 128>}, {pipeline_mode = #tpu.pipeline_mode<synchronous>, transform_indices = @transform_2, window_bounds = array<i64: 128, 256>}, {pipeline_mode = #tpu.pipeline_mode<synchronous>, transform_indices = @transform_3, window_bounds = array<i64: 128, 256>}, {pipeline_mode = #tpu.pipeline_mode<synchronous>, transform_indices = @transform_4, window_bounds = array<i64: 1, 256>}, {pipeline_mode = #tpu.pipeline_mode<synchronous>, transform_indices = @transform_5, window_bounds = array<i64: 128, 128>}, {pipeline_mode = #tpu.pipeline_mode<synchronous>, transform_indices = @transform_6, window_bounds = array<i64: 1, 128>}, {pipeline_mode = #tpu.pipeline_mode<synchronous>, transform_indices = @transform_7, window_bounds = array<i64: 1, 128>}, {transform_indices = @transform_8, window_bounds = array<i64: 8, 128>}]} {
    %c0 = arith.constant 0 : index
    %c0_0 = arith.constant 0 : index
    %0 = vector.load %arg1[%c0, %c0_0] : memref<8x128xf32, #tpu.memory_space<vmem>>, vector<8x128xf32>
    %c0_1 = arith.constant 0 : index
    %c0_2 = arith.constant 0 : index
    %1 = vector.load %arg2[%c0_1, %c0_2] : memref<8x128xf32, #tpu.memory_space<vmem>>, vector<8x128xf32>
    %c0_3 = arith.constant 0 : index
    %c0_4 = arith.constant 0 : index
    %2 = vector.load %arg3[%c0_3, %c0_4] : memref<128x256xf32, #tpu.memory_space<vmem>>, vector<128x256xf32>
    %cst = arith.constant dense<0.000000e+00> : vector<8x256xf32>
    %3 = tpu.matmul %0, %2, %cst {dimension_numbers = #tpu.dot_dimension_numbers<[1], [0], [0], [1], [0, 0, 1, 1], [], []>, precision = #tpu.contract_precision<fp32>} : vector<8x128xf32>, vector<128x256xf32>, vector<8x256xf32> -> vector<8x256xf32>
    %c0_5 = arith.constant 0 : index
    %c0_6 = arith.constant 0 : index
    %4 = vector.load %arg4[%c0_5, %c0_6] : memref<128x256xf32, #tpu.memory_space<vmem>>, vector<128x256xf32>
    %cst_7 = arith.constant dense<0.000000e+00> : vector<8x256xf32>
    %5 = tpu.matmul %1, %4, %cst_7 {dimension_numbers = #tpu.dot_dimension_numbers<[1], [0], [0], [1], [0, 0, 1, 1], [], []>, precision = #tpu.contract_precision<fp32>} : vector<8x128xf32>, vector<128x256xf32>, vector<8x256xf32> -> vector<8x256xf32>
    %6 = arith.addf %3, %5 : vector<8x256xf32>
    %c0_8 = arith.constant 0 : index
    %c0_9 = arith.constant 0 : index
    %7 = vector.load %arg5[%c0_8, %c0_9] : memref<1x256xf32, #tpu.memory_space<vmem>>, vector<1x256xf32>
    %8 = vector.broadcast %7 : vector<1x256xf32> to vector<8x256xf32>
    %9 = arith.addf %6, %8 : vector<8x256xf32>
    %cst_10 = arith.constant 5.000000e-01 : f32
    %10 = vector.broadcast %cst_10 : f32 to vector<8x256xf32>
    %11 = arith.mulf %10, %9 : vector<8x256xf32>
    %12 = math.tanh %11 : vector<8x256xf32>
    %cst_11 = arith.constant 5.000000e-01 : f32
    %13 = vector.broadcast %cst_11 : f32 to vector<8x256xf32>
    %14 = arith.mulf %13, %12 : vector<8x256xf32>
    %cst_12 = arith.constant 5.000000e-01 : f32
    %15 = vector.broadcast %cst_12 : f32 to vector<8x256xf32>
    %16 = arith.addf %14, %15 : vector<8x256xf32>
    %17 = vector.extract_strided_slice %16 {offsets = [0, 0], sizes = [8, 128], strides = [1, 1]} : vector<8x256xf32> to vector<8x128xf32>
    %18 = vector.extract_strided_slice %16 {offsets = [0, 128], sizes = [8, 128], strides = [1, 1]} : vector<8x256xf32> to vector<8x128xf32>
    %19 = arith.mulf %17, %0 : vector<8x128xf32>
    %20 = arith.mulf %18, %1 : vector<8x128xf32>
    %21 = arith.addf %19, %20 : vector<8x128xf32>
    %c0_13 = arith.constant 0 : index
    %c0_14 = arith.constant 0 : index
    %22 = vector.load %arg6[%c0_13, %c0_14] : memref<128x128xf32, #tpu.memory_space<vmem>>, vector<128x128xf32>
    %cst_15 = arith.constant dense<0.000000e+00> : vector<8x128xf32>
    %23 = tpu.matmul %21, %22, %cst_15 {dimension_numbers = #tpu.dot_dimension_numbers<[1], [0], [0], [1], [0, 0, 1, 1], [], []>, precision = #tpu.contract_precision<fp32>} : vector<8x128xf32>, vector<128x128xf32>, vector<8x128xf32> -> vector<8x128xf32>
    %24 = arith.subf %21, %23 : vector<8x128xf32>
    %25 = arith.mulf %24, %24 : vector<8x128xf32>
    %c0_16 = arith.constant 0 : index
    %c0_17 = arith.constant 0 : index
    %26 = vector.load %arg6[%c0_16, %c0_17] : memref<128x128xf32, #tpu.memory_space<vmem>>, vector<128x128xf32>
    %cst_18 = arith.constant dense<0.000000e+00> : vector<8x128xf32>
    %27 = tpu.matmul %25, %26, %cst_18 {dimension_numbers = #tpu.dot_dimension_numbers<[1], [0], [0], [1], [0, 0, 1, 1], [], []>, precision = #tpu.contract_precision<fp32>} : vector<8x128xf32>, vector<128x128xf32>, vector<8x128xf32> -> vector<8x128xf32>
    %cst_19 = arith.constant 9.99999974E-6 : f32
    %28 = vector.broadcast %cst_19 : f32 to vector<8x128xf32>
    %29 = arith.addf %27, %28 : vector<8x128xf32>
    %30 = math.rsqrt %29 : vector<8x128xf32>
    %31 = arith.mulf %24, %30 : vector<8x128xf32>
    %c0_20 = arith.constant 0 : index
    %c0_21 = arith.constant 0 : index
    %32 = vector.load %arg7[%c0_20, %c0_21] : memref<1x128xf32, #tpu.memory_space<vmem>>, vector<1x128xf32>
    %33 = vector.broadcast %32 : vector<1x128xf32> to vector<8x128xf32>
    %34 = arith.mulf %31, %33 : vector<8x128xf32>
    %c0_22 = arith.constant 0 : index
    %c0_23 = arith.constant 0 : index
    %35 = vector.load %arg8[%c0_22, %c0_23] : memref<1x128xf32, #tpu.memory_space<vmem>>, vector<1x128xf32>
    %36 = vector.broadcast %35 : vector<1x128xf32> to vector<8x128xf32>
    %37 = arith.addf %34, %36 : vector<8x128xf32>
    %c0_24 = arith.constant 0 : index
    %c0_25 = arith.constant 0 : index
    %38 = vector.load %arg9[%c0_24, %c0_25] : memref<8x128xf32, #tpu.memory_space<vmem>>, vector<8x128xf32>
    tpu.vector_store %arg9[%c0_24, %c0_25], %37 {strides = array<i32>} : memref<8x128xf32, #tpu.memory_space<vmem>>, vector<8x128xf32>,
    return
  }
  func.func @transform_0(%arg0: i32) -> (i32, i32) {
    %c0_i32 = arith.constant 0 : i32
    %c0_i32_0 = arith.constant 0 : i32
    return %arg0, %c0_i32 : i32, i32
  }
  func.func @transform_1(%arg0: i32) -> (i32, i32) {
    %c0_i32 = arith.constant 0 : i32
    %c0_i32_0 = arith.constant 0 : i32
    return %arg0, %c0_i32 : i32, i32
  }
  func.func @transform_2(%arg0: i32) -> (i32, i32) {
    %c0_i32 = arith.constant 0 : i32
    %c0_i32_0 = arith.constant 0 : i32
    %c0_i32_1 = arith.constant 0 : i32
    return %c0_i32, %c0_i32_0 : i32, i32
  }
  func.func @transform_3(%arg0: i32) -> (i32, i32) {
    %c0_i32 = arith.constant 0 : i32
    %c0_i32_0 = arith.constant 0 : i32
    %c0_i32_1 = arith.constant 0 : i32
    return %c0_i32, %c0_i32_0 : i32, i32
  }
  func.func @transform_4(%arg0: i32) -> (i32, i32) {
    %c0_i32 = arith.constant 0 : i32
    %c0_i32_0 = arith.constant 0 : i32
    %c0_i32_1 = arith.constant 0 : i32
    return %c0_i32, %c0_i32_0 : i32, i32
  }
  func.func @transform_5(%arg0: i32) -> (i32, i32) {
    %c0_i32 = arith.constant 0 : i32
    %c0_i32_0 = arith.constant 0 : i32
    %c0_i32_1 = arith.constant 0 : i32
    return %c0_i32, %c0_i32_0 : i32, i32
  }
  func.func @transform_6(%arg0: i32) -> (i32, i32) {
    %c0_i32 = arith.constant 0 : i32
    %c0_i32_0 = arith.constant 0 : i32
    %c0_i32_1 = arith.constant 0 : i32
    return %c0_i32, %c0_i32_0 : i32, i32
  }
  func.func @transform_7(%arg0: i32) -> (i32, i32) {
    %c0_i32 = arith.constant 0 : i32
    %c0_i32_0 = arith.constant 0 : i32
    %c0_i32_1 = arith.constant 0 : i32
    return %c0_i32, %c0_i32_0 : i32, i32
  }
  func.func @transform_8(%arg0: i32) -> (i32, i32) {
    %c0_i32 = arith.constant 0 : i32
    %c0_i32_0 = arith.constant 0 : i32
    return %arg0, %c0_i32 : i32, i32
  }
}

</mosaic_0001>

<bundles_post_ra>
// kernel: tpu_custom_call.1
= control target key start
LH: loop header
LB: loop body
LE: loop exit
PB: predicated region body
PF: predicated region fallthrough
CT: control target
= control target key end

     0   :  { %13 = vsyncpa [#allocation3], 0  ;;  %s6242_s0 = inlined_call_operand.hbm [shape: f32[8,128], index: 0, kind: input, shape index: {}]   ;;  %s6243_s1 = inlined_call_operand.hbm [shape: f32[8,128], index: 1, kind: input, shape index: {}]   ;;  %s6244_s2 = inlined_call_operand.hbm [shape: f32[128,256], index: 2, kind: input, shape index: {}]   ;;  %s6245_s3 = inlined_call_operand.hbm [shape: f32[128,256], index: 3, kind: input, shape index: {}]   ;;  %s6246_s4 = inlined_call_operand.vmem [shape: f32[1,256], index: 4, kind: input, shape index: {}]   ;;  %s6247_s5 = inlined_call_operand.hbm [shape: f32[128,128], index: 5, kind: input, shape index: {}]   ;;  %s6248_s6 = inlined_call_operand.vmem [shape: f32[1,128], index: 6, kind: input, shape index: {}]   ;;  %s6249_s7 = inlined_call_operand.vmem [shape: f32[1,128], index: 7, kind: input, shape index: {}]   ;;  %s6250_s8 = inlined_call_operand.hbm [shape: f32[8,128], index: 8, kind: output, shape index: {}]  }
   0x1   :  { %14 = vsyncpa [#allocation6], 0 }
   0x2   :  { %15 = vsyncpa [#allocation9], 0 }
   0x3   :  { %16 = vsyncpa [#allocation4], 0  ;;  %s4732_s27 = smov [#allocation5]   ;;  %s4592_s9 = scalar_lea.hbm %s6243_s1, 128 }
   0x4   :  { %s33_s28 = sshll.u32 %s4732_s27, 4  ;;  %p4593_p0 = scmp.ne.s32.totalorder %s6243_s1, %s4592_s9  ;;  %s34_s28 = int_to_ptr.vmem [resolvable:$true] %s33_s28 }
   0x5   :  { %p4596_p1 = scmp.lt.u32.totalorder %s4592_s9, %s6243_s1 }
   0x7   :  { %p4598_p2 = pnand %p4596_p1, %p4593_p0 }
   0x9   :  { %4601 = shalt.err (!%p4598_p2)
}
   0xa   :  { %s4602_s14 = scalar_lea.vmem %s34_s28, 128  ;;  %p4607_p4 = scmp.lt.s32.totalorder %s34_s28, %s34_s28 }
   0xb   :  { %p4603_p3 = scmp.ne.s32.totalorder %s34_s28, %s4602_s14  ;;  %p4608_p5 = scmp.lt.s32.totalorder %s4602_s14, %s4602_s14 }
   0xd   :  { %p4609_p6 = por %p4608_p5, %p4607_p4 }
   0xf   :  { %p4610_p7 = pnand %p4609_p6, %p4603_p3 }
  0x11   :  { %4613 = shalt.err (!%p4610_p7)
}
  0x12   :  { %36 = dma.hbm_to_vmem [thread:$0]  %s6243_s1, 128, %s34_s28, [#allocation6]  }
  0x13   :  { %s4733_s17 = smov [#allocation8]   ;;  %s4734_s19 = smov [#allocation2]  }
  0x14   :  { %s54_s18 = sshll.u32 %s4733_s17, 4  ;;  %s23_s20 = sshll.u32 %s4734_s19, 4  ;;  %s55_s18 = int_to_ptr.vmem [resolvable:$true] %s54_s18  ;;  %s24_s20 = int_to_ptr.vmem [resolvable:$true] %s23_s20 }
  0x15   :  { %s4614_s23 = scalar_lea.hbm %s6245_s3, 4096 }
  0x16   :  { %p4615_p8 = scmp.ne.s32.totalorder %s6245_s3, %s4614_s23  ;;  %p4618_p9 = scmp.lt.u32.totalorder %s4614_s23, %s6245_s3 }
  0x18   :  { %p4620_p10 = pnand %p4618_p9, %p4615_p8 }
  0x1a   :  { %4623 = shalt.err (!%p4620_p10)
}
  0x1b   :  { %s4624_s1 = scalar_lea.vmem %s55_s18, 4096  ;;  %p4629_p12 = scmp.lt.s32.totalorder %s55_s18, %s55_s18 }
  0x1c   :  { %p4625_p11 = scmp.ne.s32.totalorder %s55_s18, %s4624_s1  ;;  %p4630_p13 = scmp.lt.s32.totalorder %s4624_s1, %s4624_s1 }
  0x1e   :  { %p4631_p0 = por %p4630_p13, %p4629_p12 }
  0x20   :  { %p4632_p1 = pnand %p4631_p0, %p4625_p11 }
  0x22   :  { %4635 = shalt.err (!%p4632_p1)
}
  0x23   :  { %s4735_s28 = smov 256   ;;  %s4736_s29 = smov 16  }
  0x24   :  { %60 = dma.hbm_to_vmem [thread:$0]  %s6245_s3, 4096, %s55_s18, [#allocation9], %s4735_s28, %s4735_s28, %s4736_s29  }
  0x25   :  { %s4636_s12 = scalar_lea.hbm %s6242_s0, 128 }
  0x26   :  { %p4637_p2 = scmp.ne.s32.totalorder %s6242_s0, %s4636_s12  ;;  %p4640_p3 = scmp.lt.u32.totalorder %s4636_s12, %s6242_s0 }
  0x28   :  { %p4642_p4 = pnand %p4640_p3, %p4637_p2 }
  0x2a   :  { %4645 = shalt.err (!%p4642_p4)
}
  0x2b   :  { %s4646_s17 = scalar_lea.vmem %s24_s20, 128  ;;  %p4651_p6 = scmp.lt.s32.totalorder %s24_s20, %s24_s20 }
  0x2c   :  { %p4647_p5 = scmp.ne.s32.totalorder %s24_s20, %s4646_s17  ;;  %p4652_p7 = scmp.lt.s32.totalorder %s4646_s17, %s4646_s17 }
  0x2e   :  { %p4653_p8 = por %p4652_p7, %p4651_p6 }
  0x30   :  { %p4654_p9 = pnand %p4653_p8, %p4647_p5 }
  0x32   :  { %4657 = shalt.err (!%p4654_p9)
}
  0x33   :  { %26 = dma.hbm_to_vmem [thread:$0]  %s6242_s0, 128, %s24_s20, [#allocation3]  }
  0x34   :  { %s4737_s19 = smov [#allocation7]   ;;  %s4738_s22 = smov [#allocation10]  }
  0x35   :  { %s42_s21 = sshll.u32 %s4737_s19, 4  ;;  %s68_s23 = sshll.u32 %s4738_s22, 4  ;;  %s43_s21 = int_to_ptr.vmem [resolvable:$true] %s42_s21  ;;  %s69_s23 = int_to_ptr.vmem [resolvable:$true] %s68_s23 }
  0x36   :  { %s4658_s26 = scalar_lea.hbm %s6244_s2, 4096 }
  0x37   :  { %p4659_p10 = scmp.ne.s32.totalorder %s6244_s2, %s4658_s26  ;;  %p4662_p11 = scmp.lt.u32.totalorder %s4658_s26, %s6244_s2 }
  0x39   :  { %p4664_p12 = pnand %p4662_p11, %p4659_p10 }
  0x3b   :  { %4667 = shalt.err (!%p4664_p12)
}
  0x3c   :  { %s4668_s0 = scalar_lea.vmem %s43_s21, 4096  ;;  %p4673_p0 = scmp.lt.s32.totalorder %s43_s21, %s43_s21 }
  0x3d   :  { %p4669_p13 = scmp.ne.s32.totalorder %s43_s21, %s4668_s0  ;;  %p4674_p1 = scmp.lt.s32.totalorder %s4668_s0, %s4668_s0 }
  0x3f   :  { %p4675_p2 = por %p4674_p1, %p4673_p0 }
  0x41   :  { %p4676_p3 = pnand %p4675_p2, %p4669_p13 }
  0x43   :  { %4679 = shalt.err (!%p4676_p3)
}
  0x44   :  { %48 = dma.hbm_to_vmem [thread:$0]  %s6244_s2, 4096, %s43_s21, [#allocation6], %s4735_s28, %s4735_s28, %s4736_s29  }
  0x45   :  { %s4680_s13 = scalar_lea.hbm %s6247_s5, 2048 }
  0x46   :  { %p4681_p4 = scmp.ne.s32.totalorder %s6247_s5, %s4680_s13  ;;  %p4684_p5 = scmp.lt.u32.totalorder %s4680_s13, %s6247_s5 }
  0x48   :  { %p4686_p6 = pnand %p4684_p5, %p4681_p4 }
  0x4a   :  { %4689 = shalt.err (!%p4686_p6)
}
  0x4b   :  { %s4690_s3 = scalar_lea.vmem %s69_s23, 2048  ;;  %p4695_p8 = scmp.lt.s32.totalorder %s69_s23, %s69_s23 }
  0x4c   :  { %p4691_p7 = scmp.ne.s32.totalorder %s69_s23, %s4690_s3  ;;  %p4696_p9 = scmp.lt.s32.totalorder %s4690_s3, %s4690_s3 }
  0x4e   :  { %p4697_p10 = por %p4696_p9, %p4695_p8 }
  0x50   :  { %p4698_p11 = pnand %p4697_p10, %p4691_p7 }
  0x52   :  { %4701 = shalt.err (!%p4698_p11)
}
  0x53   :  { %s4739_s2 = smov 128   ;;  %s4740_s28 = smov 8  }
  0x54   :  { %74 = dma.hbm_to_vmem [thread:$0]  %s6247_s5, 2048, %s69_s23, [#allocation9], %s4739_s2, %s4739_s2, %s4740_s28  }
  0x55   :  { %4724 = dma.done.wait [#allocation3], 128  }
  0x56   :  { %4725 = vsyncadd [#allocation3], 4294967168 }
  0x57   :  { %4726 = dma.done.wait [#allocation6], 4224  }
  0x58   :  { %4727 = vsyncadd [#allocation6], 4294963072 }
  0x59   :  { %4728 = dma.done.wait [#allocation9], 6144  }
  0x5a   :  { %4729 = vsyncadd [#allocation9], 4294961152  ;;  %v6253_v0 = vmov 0.0   ;;  %v129_v1 = vld [vmem:[#allocation8 + $0x8] sm:$0xff]  ;;  %v131_v2 = vld [vmem:[#allocation8 + $0x18] sm:$0xff]  ;;  %vm4743_vm0 = vmmov 0  }
  0x5b   :  { %256 = vmatprep.mubr.f32.mxu0 %v6253_v0  ;;  %v128_v3 = vld [vmem:[#allocation8] sm:$0xff]  ;;  %v160_v4 = vand.u32 4294901760, %v129_v1  ;;  %v164_v5 = vand.u32 4294901760, %v131_v2  ;;  %v130_v6 = vld [vmem:[#allocation8 + $0x10] sm:$0xff]  ;;  %v133_v8 = vld [vmem:[#allocation8 + $0x28] sm:$0xff]  ;;  %s4744_s24 = smov [#allocation11]  }
  0x5c   :  { %v162_v7 = vand.u32 4294901760, %v128_v3  ;;  %v135_v9 = vld [vmem:[#allocation8 + $0x38] sm:$0xff]  ;;  %v166_v10 = vand.u32 4294901760, %v130_v6  ;;  %v168_v11 = vand.u32 4294901760, %v133_v8  ;;  %v132_v13 = vld [vmem:[#allocation8 + $0x20] sm:$0xff]  ;;  %v134_v14 = vld [vmem:[#allocation8 + $0x30] sm:$0xff] }
  0x5d   :  { %v172_v12 = vand.u32 4294901760, %v135_v9  ;;  %v137_v15 = vld [vmem:[#allocation8 + $0x48] sm:$0xff]  ;;  %v4857_v16 = vpack.c.bf16 %v164_v5, %v160_v4  ;;  %v139_v17 = vld [vmem:[#allocation8 + $0x58] sm:$0xff]  ;;  %v136_v18 = vld [vmem:[#allocation8 + $0x40] sm:$0xff]  ;;  %v170_v23 = vand.u32 4294901760, %v132_v13  ;;  %v174_v24 = vand.u32 4294901760, %v134_v14 }
  0x5e   :  { %v138_v19 = vld [vmem:[#allocation8 + $0x50] sm:$0xff]  ;;  %v4859_v20 = vpack.c.bf16 %v166_v10, %v162_v7  ;;  %v141_v22 = vld [vmem:[#allocation8 + $0x68] sm:$0xff]  ;;  %v176_v25 = vand.u32 4294901760, %v137_v15  ;;  %v180_v26 = vand.u32 4294901760, %v139_v17  ;;  %v178_v27 = vand.u32 4294901760, %v136_v18  ;;  %v143_v29 = vld [vmem:[#allocation8 + $0x78] sm:$0xff] }
  0x5f   :  { %6363 = vst [vmem:[#allocation16_spill] sm:$0xff] %v4857_v16  ;;  %v4861_v21 = vpack.c.bf16 %v172_v12, %v168_v11  ;;  %3858 = vmatprep.subr.bf16.mxu0 %v4857_v16  ;;  %v182_v28 = vand.u32 4294901760, %v138_v19  ;;  %v140_v30 = vld [vmem:[#allocation8 + $0x60] sm:$0xff]  ;;  %v4866_v31 = vpack.c.bf16 %v174_v24, %v170_v23  ;;  %v184_v32 = vand.u32 4294901760, %v141_v22  ;;  %v142_v33 = vld [vmem:[#allocation8 + $0x70] sm:$0xff]  ;;  %v145_v34 = vld [vmem:[#allocation8 + $0x88] sm:$0xff] }
  0x60   :  { %6364 = vst [vmem:[#allocation17_spill] sm:$0xff] %v4859_v20  ;;  %3860 = vmatpush1.bf16.msra.mxu0 %v4859_v20  ;;  %v147_v35 = vld [vmem:[#allocation8 + $0x98] sm:$0xff]  ;;  %v4868_v36 = vsub.f32 %v129_v1, %v160_v4  ;;  %v4870_v37 = vsub.f32 %v131_v2, %v164_v5  ;;  %v4872_v38 = vsub.f32 %v128_v3, %v162_v7  ;;  %v188_v43 = vand.u32 4294901760, %v143_v29  ;;  %v144_v48 = vld [vmem:[#allocation8 + $0x80] sm:$0xff]  ;;  %v146_v49 = vld [vmem:[#allocation8 + $0x90] sm:$0xff]  ;;  %s3220_s25 = sshll.u32 %s4744_s24, 4  ;;  %s3221_s25 = int_to_ptr.vmem [resolvable:$true] %s3220_s25 }
  0x61   :  { %6365 = vst [vmem:[#allocation18_spill] sm:$0xff] %v4861_v21  ;;  %3862 = vmatprep.subr.bf16.mxu0 %v4861_v21  ;;  %6366 = vst [vmem:[#allocation19_spill] sm:$0xff] %v4866_v31  ;;  %v4874_v39 = vpack.c.bf16 %v180_v26, %v176_v25  ;;  %v4876_v40 = vsub.f32 %v130_v6, %v166_v10  ;;  %v4878_v41 = vsub.f32 %v133_v8, %v168_v11  ;;  %v149_v54 = vld [vmem:[#allocation8 + $0xa8] sm:$0xff]  ;;  %v151_v55 = vld [vmem:[#allocation8 + $0xb8] sm:$0xff]  ;;  %s4702_s26 = scalar_lea.vmem %s3221_s25, 128  ;;  %p4707_p13 = scmp.lt.s32.totalorder %s3221_s25, %s3221_s25 }
  0x62   :  { %v4880_v42 = vpack.c.bf16 %v182_v28, %v178_v27  ;;  %v186_v44 = vand.u32 4294901760, %v140_v30  ;;  %v190_v45 = vand.u32 4294901760, %v142_v33  ;;  %v192_v46 = vand.u32 4294901760, %v145_v34  ;;  %v148_v56 = vld [vmem:[#allocation8 + $0xa0] sm:$0xff]  ;;  %v150_v61 = vld [vmem:[#allocation8 + $0xb0] sm:$0xff]  ;;  %v153_v62 = vld [vmem:[#allocation8 + $0xc8] sm:$0xff]  ;;  %p4703_p12 = scmp.ne.s32.totalorder %s3221_s25, %s4702_s26  ;;  %p4708_p0 = scmp.lt.s32.totalorder %s4702_s26, %s4702_s26 }
  0x63   :  { %6367 = vst [vmem:[#allocation20_spill] sm:$0xff] %v4874_v39  ;;  %v196_v47 = vand.u32 4294901760, %v147_v35  ;;  %v4883_v50 = vsub.f32 %v135_v9, %v172_v12  ;;  %v4885_v51 = vsub.f32 %v132_v13, %v170_v23  ;;  %v4887_v52 = vsub.f32 %v134_v14, %v174_v24  ;;  %v155_v63 = vld [vmem:[#allocation8 + $0xd8] sm:$0xff]  ;;  %v152_v9 = vld [vmem:[#allocation8 + $0xc0] sm:$0xff]  ;;  %v154_v10 = vld [vmem:[#allocation8 + $0xd0] sm:$0xff] }
  0x64   :  { %6368 = vst [vmem:[#allocation21_spill] sm:$0xff] %v4880_v42  ;;  %3864 = vmatpush1.bf16.msra.mxu0 %v4866_v31  ;;  %v4890_v53 = vpack.c.bf16 %v188_v43, %v184_v32  ;;  %v4892_v57 = vsub.f32 %v137_v15, %v176_v25  ;;  %v4894_v58 = vsub.f32 %v139_v17, %v180_v26  ;;  %v194_v3 = vand.u32 4294901760, %v144_v48  ;;  %v95_v26 = vld [vmem:[#allocation5] sm:$0xff]  ;;  %p4709_p1 = por %p4708_p0, %p4707_p13 }
  0x65   :  { %3866 = vmatprep.subr.bf16.mxu0 %v4874_v39  ;;  %v4896_v59 = vsub.f32 %v136_v18, %v178_v27  ;;  %v4898_v60 = vsub.f32 %v138_v19, %v182_v28  ;;  %v4900_v1 = vsub.f32 %v141_v22, %v184_v32  ;;  %v4902_v2 = vsub.f32 %v143_v29, %v188_v43  ;;  %v157_v43 = vld [vmem:[#allocation8 + $0xe8] sm:$0xff] }
  0x66   :  { %6369 = vst [vmem:[#allocation22_spill] sm:$0xff] %v4890_v53  ;;  %v198_v4 = vand.u32 4294901760, %v146_v49  ;;  %v4905_v5 = vpack.c.bf16 %v190_v45, %v186_v44  ;;  %v4907_v6 = vpack.c.bf16 %v196_v47, %v192_v46  ;;  %v200_v7 = vand.u32 4294901760, %v149_v54  ;;  %p4710_p2 = pnand %p4709_p1, %p4703_p12 }
  0x67   :  { %v204_v8 = vand.u32 4294901760, %v151_v55  ;;  %v202_v11 = vand.u32 4294901760, %v148_v56  ;;  %v206_v12 = vand.u32 4294901760, %v150_v61  ;;  %v208_v13 = vand.u32 4294901760, %v153_v62 }
  0x68   :  { %3868 = vmatpush1.bf16.msra.mxu0 %v4880_v42  ;;  %6370 = vst [vmem:[#allocation23_spill] sm:$0xff] %v4905_v5  ;;  %6371 = vst [vmem:[#allocation24_spill] sm:$0xff] %v4907_v6  ;;  %v212_v14 = vand.u32 4294901760, %v155_v63  ;;  %v4910_v15 = vsub.f32 %v140_v30, %v186_v44  ;;  %v4912_v17 = vsub.f32 %v142_v33, %v190_v45  ;;  %v210_v24 = vand.u32 4294901760, %v152_v9  ;;  %v159_v45 = vld [vmem:[#allocation8 + $0xf8] sm:$0xff] }
  0x69   :  { %3870 = vmatprep.subr.bf16.mxu0 %v4890_v53  ;;  %v4914_v18 = vsub.f32 %v145_v34, %v192_v46  ;;  %v4916_v19 = vsub.f32 %v147_v35, %v196_v47  ;;  %v4918_v22 = vpack.c.bf16 %v198_v4, %v194_v3  ;;  %v4920_v23 = vsub.f32 %v144_v48, %v194_v3 }
  0x6a   :  { %v214_v25 = vand.u32 4294901760, %v154_v10  ;;  %v4923_v27 = vsub.f32 %v146_v49, %v198_v4  ;;  %v4925_v28 = vpack.c.bf16 %v204_v8, %v200_v7  ;;  %v4927_v29 = vsub.f32 %v149_v54, %v200_v7 }
  0x6b   :  { %6372 = vst [vmem:[#allocation25_spill] sm:$0xff] %v4918_v22  ;;  %v4929_v30 = vsub.f32 %v151_v55, %v204_v8  ;;  %v4932_v32 = vpack.c.bf16 %v206_v12, %v202_v11  ;;  %v4934_v33 = vsub.f32 %v148_v56, %v202_v11  ;;  %v4936_v34 = vsub.f32 %v150_v61, %v206_v12  ;;  %v156_v56 = vld [vmem:[#allocation8 + $0xe0] sm:$0xff]  ;;  %v4952_v61 = vld [vmem:[#allocation8 + $0xf0] sm:$0xff] }
  0x6c   :  { %3872 = vmatpush1.bf16.msra.mxu0 %v4905_v5  ;;  %6373 = vst [vmem:[#allocation26_spill] sm:$0xff] %v4925_v28  ;;  %v4938_v35 = vpack.c.bf16 %v212_v14, %v208_v13  ;;  %v4940_v44 = vsub.f32 %v153_v62, %v208_v13  ;;  %v6251_v46 = vand.u32 4294901760, %v4868_v36  ;;  %v6252_v47 = vand.u32 4294901760, %v4870_v37 }
  0x6d   :  { %3874 = vmatprep.subr.bf16.mxu0 %v4907_v6  ;;  %6374 = vst [vmem:[#allocation27_spill] sm:$0xff] %v4932_v32  ;;  %v4944_v48 = vand.u32 4294901760, %v95_v26  ;;  %v4946_v49 = vsub.f32 %v155_v63, %v212_v14  ;;  %v4948_v54 = vpack.c.bf16 %v214_v25, %v210_v24  ;;  %v4950_v55 = vsub.f32 %v152_v9, %v210_v24 }
  0x6e   :  { %6375 = vst [vmem:[#allocation28_spill] sm:$0xff] %v4938_v35  ;;  %v6255_v3 = vand.u32 4294901760, %v4872_v38  ;;  %v4956_v62 = vsub.f32 %v154_v10, %v214_v25  ;;  %v216_v4 = vand.u32 4294901760, %v157_v43  ;;  %v271_v7 = vsub.f32 %v4868_v36, %v6251_v46 }
  0x6f   :  { %6376 = vst [vmem:[#allocation29_spill] sm:$0xff] %v4946_v49  ;;  %6377 = vst [vmem:[#allocation30_spill] sm:$0xff] %v4948_v54  ;;  %v283_v63 = vsub.f32 %v4870_v37, %v6252_v47  ;;  %v220_v8 = vand.u32 4294901760, %v159_v45  ;;  %v4966_v9 = vsub.f32 %v95_v26, %v4944_v48  ;;  %v6256_v11 = vand.u32 4294901760, %v4876_v40 }
  0x70   :  { %6378 = vst [vmem:[#allocation31_spill] sm:$0xff] %v4950_v55  ;;  %3876 = vmatpush1.bf16.msra.mxu0 %v4918_v22  ;;  %6379 = vst [vmem:[#allocation32_spill] sm:$0xff] %v4956_v62  ;;  %v6261_v10 = vand.u32 4294901760, %v4878_v41  ;;  %v218_v12 = vand.u32 4294901760, %v156_v56  ;;  %v6262_v14 = vand.u32 4294901760, %v4883_v50  ;;  %v272_v25 = vand.u32 4294901760, %v271_v7 }
  0x71   :  { %3878 = vmatprep.subr.bf16.mxu0 %v4925_v28  ;;  %6380 = vst [vmem:[#allocation33_spill] sm:$0xff] %v4966_v9  ;;  %v284_v46 = vand.u32 4294901760, %v283_v63  ;;  %v277_v26 = vsub.f32 %v4872_v38, %v6255_v3  ;;  %v289_v0 = vsub.f32 %v4876_v40, %v6256_v11  ;;  %v6271_v63 = vand.u32 4294901760, %v4887_v52 }
  0x72   :  { %v295_v13 = vsub.f32 %v4878_v41, %v6261_v10  ;;  %v307_v7 = vsub.f32 %v4883_v50, %v6262_v14  ;;  %v4989_v47 = vpack.c.bf16 %v220_v8, %v216_v4  ;;  %v4991_v3 = vsub.f32 %v157_v43, %v216_v4 }
  0x73   :  { %v4993_v24 = vsub.f32 %v159_v45, %v220_v8  ;;  %v6384_v10 = vand.u32 4294901760, %v4885_v51  ;;  %v6276_v22 = vand.u32 4294901760, %v4894_v58  ;;  %v3889_v43 = vpack.c.bf16 %v284_v46, %v272_v25 }
  0x74   :  { %3880 = vmatpush1.bf16.msra.mxu0 %v4932_v32  ;;  %6381 = vst [vmem:[#allocation34_spill] sm:$0xff] %v4989_v47  ;;  %v6382_v32 = vand.u32 4294901760, %v4952_v61  ;;  %v6385_v45 = vand.u32 4294901760, %v4966_v9  ;;  %v278_v8 = vand.u32 4294901760, %v277_v26  ;;  %v296_v6 = vand.u32 4294901760, %v295_v13 }
  0x75   :  { %3882 = vmatprep.subr.bf16.mxu0 %v4938_v35  ;;  %v301_v14 = vsub.f32 %v4885_v51, %v6384_v10  ;;  %v313_v35 = vsub.f32 %v4887_v52, %v6271_v63  ;;  %v308_v5 = vand.u32 4294901760, %v307_v7  ;;  %v6279_v10 = vand.u32 4294901760, %v4898_v60 }
  0x76   :  { %v4998_v28 = vpack.c.bf16 %v6382_v32, %v218_v12  ;;  %v260_v4 = vsub.f32 %v4966_v9, %v6385_v45  ;;  %v290_v32 = vand.u32 4294901760, %v289_v0  ;;  %v6386_v63 = vand.u32 4294901760, %v4892_v57 }
  0x77   :  { %v331_v25 = vsub.f32 %v4894_v58, %v6276_v22  ;;  %v6284_v26 = vand.u32 4294901760, %v4900_v1  ;;  %v6289_v45 = vand.u32 4294901760, %v4902_v2  ;;  %v302_v11 = vand.u32 4294901760, %v301_v14 }
  0x78   :  { %6383 = vst [vmem:[#allocation35_spill] sm:$0xff] %v4998_v28  ;;  %3884 = vmatpush1.bf16.msra.mxu0 %v4948_v54  ;;  %v319_v46 = vsub.f32 %v4892_v57, %v6386_v63  ;;  %v314_v0 = vand.u32 4294901760, %v313_v35  ;;  %v6387_v13 = vand.u32 4294901760, %v4896_v59  ;;  %v261_v54 = vand.u32 4294901760, %v260_v4 }
  0x79   :  { %3886 = vmatprep.subr.bf16.mxu0 %v4989_v47  ;;  %v337_v47 = vsub.f32 %v4898_v60, %v6279_v10  ;;  %v343_v63 = vsub.f32 %v4900_v1, %v6284_v26  ;;  %v355_v22 = vsub.f32 %v4902_v2, %v6289_v45  ;;  %v5036_v35 = vsub.f32 %v156_v56, %v218_v12 }
  0x7a   :  { %v325_v7 = vsub.f32 %v4896_v59, %v6387_v13  ;;  %v3891_v13 = vpack.c.bf16 %v290_v32, %v278_v8  ;;  %v6300_v53 = vand.u32 4294901760, %v4912_v17  ;;  %v6294_v10 = vand.u32 4294901760, %v4914_v18 }
  0x7b   :  { %v3893_v4 = vpack.c.bf16 %v308_v5, %v296_v6  ;;  %v320_v42 = vand.u32 4294901760, %v319_v46  ;;  %v332_v39 = vand.u32 4294901760, %v331_v25  ;;  %v6293_v26 = vand.u32 4294901760, %v4916_v19 }
  0x7c   :  { %3888 = vmatpush1.bf16.msra.mxu0 %v4998_v28  ;;  %v3895_v31 = vpack.c.bf16 %v314_v0, %v302_v11  ;;  %v326_v21 = vand.u32 4294901760, %v325_v7  ;;  %v338_v45 = vand.u32 4294901760, %v337_v47  ;;  %v6292_v14 = vand.u32 4294901760, %v4920_v23 }
  0x7d   :  { %3890 = vmatprep.subr.bf16.mxu0 %v3889_v43  ;;  %v344_v28 = vand.u32 4294901760, %v343_v63  ;;  %v356_v56 = vand.u32 4294901760, %v355_v22  ;;  %v6388_v12 = vand.u32 4294901760, %v4910_v15  ;;  %v6295_v32 = vand.u32 4294901760, %v4923_v27 }
  0x7e   :  { %v361_v5 = vsub.f32 %v4912_v17, %v6300_v53  ;;  %v367_v6 = vsub.f32 %v4914_v18, %v6294_v10  ;;  %v379_v47 = vsub.f32 %v4916_v19, %v6293_v26  ;;  %v6389_v22 = vmov 0.0  }
  0x7f   :  { %262 = vmatmul.mubr.f32.vlgmr.msra.gmra.mrb[0].mxu0 %v261_v54  ;;  %v349_v8 = vsub.f32 %v4910_v15, %v6388_v12  ;;  %v3897_v54 = vpack.c.bf16 %v332_v39, %v320_v42  ;;  %v373_v11 = vsub.f32 %v4920_v23, %v6292_v14  ;;  %v6299_v43 = vand.u32 4294901760, %v4927_v29 }
  0x80   :  { %3892 = vmatpush1.bf16.msra.mxu0 %v3891_v13  ;;  %492 = vmatprep.mubr.f32.mxu0 %v6389_v22  ;;  %v6298_v46 = vand.u32 4294901760, %v4929_v30  ;;  %v6390_v25 = vand.u32 4294901760, %v4952_v61  ;;  %v385_v7 = vsub.f32 %v4923_v27, %v6295_v32  ;;  %v6296_v63 = vand.u32 4294901760, %v4934_v33 }
  0x81   :  { %3894 = vmatprep.subr.bf16.mxu0 %v3893_v4  ;;  %v6297_v39 = vand.u32 4294901760, %v4936_v34  ;;  %v3899_v42 = vpack.c.bf16 %v338_v45, %v326_v21  ;;  %v3901_v13 = vpack.c.bf16 %v356_v56, %v344_v28  ;;  %v350_v4 = vand.u32 4294901760, %v349_v8 }
  0x82   :  { %v5064_v0 = vsub.f32 %v4952_v61, %v6390_v25  ;;  %v6303_v12 = vand.u32 4294901760, %v4940_v44  ;;  %v362_v14 = vand.u32 4294901760, %v361_v5  ;;  %v368_v26 = vand.u32 4294901760, %v367_v6 }
  0x83   :  { %v380_v10 = vand.u32 4294901760, %v379_v47  ;;  %v426_v61 = vand.u32 4294901760, %v4946_v49  ;;  %v374_v25 = vand.u32 4294901760, %v373_v11  ;;  %v391_v32 = vsub.f32 %v4927_v29, %v6299_v43 }
  0x84   :  { %3896 = vmatpush1.bf16.msra.mxu0 %v3895_v31  ;;  %v403_v21 = vsub.f32 %v4929_v30, %v6298_v46  ;;  %v420_v28 = vand.u32 4294901760, %v4950_v55  ;;  %v386_v45 = vand.u32 4294901760, %v385_v7  ;;  %v397_v31 = vsub.f32 %v4934_v33, %v6296_v63 }
  0x85   :  { %3898 = vmatprep.subr.bf16.mxu0 %v3897_v54  ;;  %v409_v56 = vsub.f32 %v4936_v34, %v6297_v39  ;;  %v432_v8 = vand.u32 4294901760, %v4956_v62  ;;  %v415_v5 = vsub.f32 %v4940_v44, %v6303_v12  ;;  %v427_v6 = vsub.f32 %v4946_v49, %v426_v61 }
  0x86   :  { %v438_v47 = vand.u32 4294901760, %v4991_v3  ;;  %v450_v54 = vand.u32 4294901760, %v4993_v24  ;;  %v3903_v11 = vpack.c.bf16 %v362_v14, %v350_v4  ;;  %v421_v7 = vsub.f32 %v4950_v55, %v420_v28 }
  0x87   :  { %v433_v63 = vsub.f32 %v4956_v62, %v432_v8  ;;  %v444_v39 = vand.u32 4294901760, %v5036_v35  ;;  %v3905_v46 = vpack.c.bf16 %v380_v10, %v368_v26  ;;  %v392_v43 = vand.u32 4294901760, %v391_v32 }
  0x88   :  { %3900 = vmatpush1.bf16.msra.mxu0 %v3899_v42  ;;  %v404_v53 = vand.u32 4294901760, %v403_v21  ;;  %v3907_v20 = vpack.c.bf16 %v386_v45, %v374_v25  ;;  %v398_v12 = vand.u32 4294901760, %v397_v31  ;;  %v410_v9 = vand.u32 4294901760, %v409_v56 }
  0x89   :  { %3902 = vmatprep.subr.bf16.mxu0 %v3901_v13  ;;  %v416_v16 = vand.u32 4294901760, %v415_v5  ;;  %v428_v49 = vand.u32 4294901760, %v427_v6  ;;  %v439_v22 = vsub.f32 %v4991_v3, %v438_v47  ;;  %v451_v42 = vsub.f32 %v4993_v24, %v450_v54 }
  0x8a   :  { %v422_v14 = vand.u32 4294901760, %v421_v7  ;;  %v434_v4 = vand.u32 4294901760, %v433_v63  ;;  %v445_v62 = vsub.f32 %v5036_v35, %v444_v39  ;;  %v456_v55 = vand.u32 4294901760, %v5064_v0 }
  0x8b   :  { %v3909_v10 = vpack.c.bf16 %v404_v53, %v392_v43  ;;  %v3911_v26 = vpack.c.bf16 %v410_v9, %v398_v12  ;;  %v3913_v32 = vpack.c.bf16 %v428_v49, %v416_v16  ;;  %v440_v13 = vand.u32 4294901760, %v439_v22 }
  0x8c   :  { %3904 = vmatpush1.bf16.msra.mxu0 %v3903_v11  ;;  %v452_v25 = vand.u32 4294901760, %v451_v42  ;;  %v3915_v21 = vpack.c.bf16 %v434_v4, %v422_v14  ;;  %v446_v45 = vand.u32 4294901760, %v445_v62  ;;  %v457_v31 = vsub.f32 %v5064_v0, %v456_v55 }
  0x8d   :  { %3906 = vmatprep.subr.bf16.mxu0 %v3905_v46  ;;  %v6391_v56 = vand.u32 4294901760, %v4868_v36  ;;  %v6392_v5 = vand.u32 4294901760, %v4870_v37  ;;  %v6393_v6 = vand.u32 4294901760, %v4872_v38  ;;  %v6394_v53 = vand.u32 4294901760, %v4876_v40 }
  0x8e   :  { %v6395_v16 = vand.u32 4294901760, %v4878_v41  ;;  %v6397_v62 = vand.u32 4294901760, %v4885_v51  ;;  %v6398_v22 = vand.u32 4294901760, %v4887_v52  ;;  %v6399_v46 = vand.u32 4294901760, %v4892_v57 }
  0x8f   :  { %v5105_v63 = vpack.c.bf16 %v6392_v5, %v6391_v56  ;;  %v5111_v9 = vpack.c.bf16 %v6394_v53, %v6393_v6  ;;  %v6400_v12 = vand.u32 4294901760, %v4894_v58  ;;  %v6401_v7 = vand.u32 4294901760, %v4896_v59 }
  0x90   :  { %3908 = vmatpush1.bf16.msra.mxu0 %v3907_v20  ;;  %v6396_v20 = vand.u32 4294901760, %v4883_v50  ;;  %v5123_v43 = vpack.c.bf16 %v6398_v22, %v6397_v62  ;;  %v6402_v42 = vand.u32 4294901760, %v4898_v60  ;;  %v6403_v4 = vand.u32 4294901760, %v4900_v1 }
  0x91   :  { %3910 = vmatprep.subr.bf16.mxu0 %v3909_v10  ;;  %v5129_v11 = vpack.c.bf16 %v6400_v12, %v6399_v46  ;;  %v6404_v10 = vand.u32 4294901760, %v4902_v2  ;;  %v6405_v5 = vand.u32 4294901760, %v4910_v15  ;;  %v6406_v6 = vand.u32 4294901760, %v4912_v17 }
  0x92   :  { %v5117_v49 = vpack.c.bf16 %v6396_v20, %v6395_v16  ;;  %v5135_v14 = vpack.c.bf16 %v6402_v42, %v6401_v7  ;;  %v6407_v16 = vand.u32 4294901760, %v4914_v18  ;;  %v6408_v20 = vand.u32 4294901760, %v4916_v19 }
  0x93   :  { %v5141_v56 = vpack.c.bf16 %v6404_v10, %v6403_v4  ;;  %v5147_v53 = vpack.c.bf16 %v6406_v6, %v6405_v5  ;;  %v6410_v22 = vand.u32 4294901760, %v4920_v23  ;;  %v6411_v46 = vand.u32 4294901760, %v4923_v27 }
  0x94   :  { %v5153_v62 = vpack.c.bf16 %v6408_v20, %v6407_v16  ;;  %v6413_v7 = vand.u32 4294901760, %v4927_v29  ;;  %v6414_v42 = vand.u32 4294901760, %v4929_v30  ;;  %v6415_v10 = vand.u32 4294901760, %v4934_v33  ;;  %3912 = vmatpush1.bf16.msra.mxu0 %v3911_v26 }
  0x95   :  { %v5159_v12 = vpack.c.bf16 %v6411_v46, %v6410_v22  ;;  %v6416_v5 = vand.u32 4294901760, %v4936_v34  ;;  %v6417_v16 = vand.u32 4294901760, %v4940_v44  ;;  %v5177_v22 = vpack.c.bf16 %v432_v8, %v420_v28  ;;  %3914 = vmatprep.subr.bf16.mxu0 %v3913_v32  ;;  %v6436_v8 = vld [vmem:[#allocation30_spill] sm:$0xff] }
  0x96   :  { %6409 = vst [vmem:[#allocation36_spill] sm:$0xff] %v5153_v62  ;;  %v5165_v4 = vpack.c.bf16 %v6414_v42, %v6413_v7  ;;  %v458_v62 = vand.u32 4294901760, %v457_v31  ;;  %v5179_v46 = vpack.c.bf16 %v450_v54, %v438_v47  ;;  %v3917_v7 = vpack.c.bf16 %v452_v25, %v440_v13  ;;  %v6437_v47 = vld [vmem:[#allocation34_spill] sm:$0xff]  ;;  %v6438_v54 = vld [vmem:[#allocation35_spill] sm:$0xff]  ;;  %v97_v25 = vld [vmem:[#allocation7 + $0x8] sm:$0xff] }
  0x97   :  { %6412 = vst [vmem:[#allocation37_spill] sm:$0xff] %v5159_v12  ;;  %v5171_v6 = vpack.c.bf16 %v6416_v5, %v6415_v10  ;;  %v5175_v20 = vpack.c.bf16 %v426_v61, %v6417_v16  ;;  %v5181_v12 = vpack.c.bf16 %v456_v55, %v444_v39  ;;  %v3921_v10 = vpack.c.bf16 %v4870_v37, %v4868_v36  ;;  %v105_v5 = vld [vmem:[#allocation7 + $0x48] sm:$0xff] }
  0x98   :  { %3916 = vmatpush1.bf16.msra.mxu0 %v3915_v21  ;;  %v3919_v42 = vpack.c.bf16 %v458_v62, %v446_v45  ;;  %v3923_v61 = vpack.c.bf16 %v4876_v40, %v4872_v38  ;;  %v3925_v28 = vpack.c.bf16 %v4883_v50, %v4878_v41  ;;  %v3927_v55 = vpack.c.bf16 %v4887_v52, %v4885_v51  ;;  %v99_v21 = vld [vmem:[#allocation7 + $0x18] sm:$0xff] }
  0x99   :  { %3918 = vmatprep.subr.bf16.mxu0 %v3917_v7  ;;  %v6418_v39 = vmov 0.0   ;;  %v3929_v36 = vpack.c.bf16 %v4894_v58, %v4892_v57  ;;  %v3931_v37 = vpack.c.bf16 %v4898_v60, %v4896_v59  ;;  %v3933_v38 = vpack.c.bf16 %v4902_v2, %v4900_v1  ;;  %v6419_v57 = vld [vmem:[#allocation29_spill] sm:$0xff]  ;;  %v6420_v59 = vld [vmem:[#allocation31_spill] sm:$0xff]  ;;  %v6421_v60 = vld [vmem:[#allocation32_spill] sm:$0xff] }
  0x9a   :  { %v3935_v40 = vpack.c.bf16 %v4912_v17, %v4910_v15  ;;  %v3937_v41 = vpack.c.bf16 %v4916_v19, %v4914_v18  ;;  %v3939_v50 = vpack.c.bf16 %v4923_v27, %v4920_v23  ;;  %v3941_v51 = vpack.c.bf16 %v4929_v30, %v4927_v29  ;;  %v6422_v17 = vld [vmem:[#allocation16_spill] sm:$0xff]  ;;  %v6423_v18 = vld [vmem:[#allocation33_spill] sm:$0xff]  ;;  %v6425_v23 = vld [vmem:[#allocation18_spill] sm:$0xff]  ;;  %3469 = vmatprep.mubr.msk.f32.mxu1 %vm4743_vm0, %v6418_v39 }
  0x9b   :  { %v3943_v52 = vpack.c.bf16 %v4936_v34, %v4934_v33  ;;  %v3945_v58 = vpack.c.bf16 %v6419_v57, %v4940_v44  ;;  %v3947_v1 = vpack.c.bf16 %v6421_v60, %v6420_v59  ;;  %v3949_v2 = vpack.c.bf16 %v4993_v24, %v4991_v3  ;;  %v6424_v19 = vld [vmem:[#allocation17_spill] sm:$0xff]  ;;  %v6426_v27 = vld [vmem:[#allocation19_spill] sm:$0xff]  ;;  %v6427_v29 = vld [vmem:[#allocation20_spill] sm:$0xff] }
  0x9c   :  { %3920 = vmatpush1.bf16.msra.mxu0 %v3919_v42  ;;  %v3951_v15 = vpack.c.bf16 %v5064_v0, %v5036_v35  ;;  %v6428_v30 = vld [vmem:[#allocation21_spill] sm:$0xff]  ;;  %v6429_v33 = vld [vmem:[#allocation22_spill] sm:$0xff]  ;;  %v6430_v34 = vld [vmem:[#allocation23_spill] sm:$0xff]  ;;  %v6439_v26 = vand.u32 4294901760, %v6423_v18  ;;  %v1015_v45 = vand.u32 4294901760, %v97_v25  ;;  %v1019_v31 = vand.u32 4294901760, %v99_v21 }
  0x9d   :  { %3922 = vmatprep.subr.bf16.mxu0 %v3921_v10  ;;  %v6431_v44 = vld [vmem:[#allocation24_spill] sm:$0xff]  ;;  %v6432_v3 = vld [vmem:[#allocation25_spill] sm:$0xff]  ;;  %v6433_v24 = vld [vmem:[#allocation26_spill] sm:$0xff]  ;;  %v1031_v7 = vand.u32 4294901760, %v105_v5 }
  0x9e   :  { %v6434_v35 = vld [vmem:[#allocation27_spill] sm:$0xff]  ;;  %v6435_v0 = vld [vmem:[#allocation28_spill] sm:$0xff]  ;;  %v6441_v13 = vld [vmem:[#allocation37_spill] sm:$0xff]  ;;  %v5287_v59 = vsub.f32 %v97_v25, %v1015_v45 }
  0x9f   :  { %494 = vmatmul.mubr.f32.vlgmr.msra.gmra.mrb[0].mxu0 %v4944_v48  ;;  %v6440_v32 = vld [vmem:[#allocation36_spill] sm:$0xff]  ;;  %v104_v10 = vld [vmem:[#allocation7 + $0x40] sm:$0xff] }
  0xa0   :  { %3924 = vmatpush1.bf16.msra.mxu0 %v3923_v61  ;;  %628 = vmatprep.mubr.f32.mxu0 %v6418_v39  ;;  %v106_v61 = vld [vmem:[#allocation7 + $0x50] sm:$0xff]  ;;  %v113_v57 = vld [vmem:[#allocation7 + $0x88] sm:$0xff] }
  0xa1   :  { %3926 = vmatprep.subr.bf16.mxu0 %v3925_v28  ;;  %v109_v28 = vld [vmem:[#allocation7 + $0x68] sm:$0xff] }
  0xa4   :  { %3928 = vmatpush1.bf16.msra.mxu0 %v3927_v55  ;;  %v111_v55 = vld [vmem:[#allocation7 + $0x78] sm:$0xff] }
  0xa5   :  { %3930 = vmatprep.subr.bf16.mxu0 %v3929_v36 }
  0xa8   :  { %3932 = vmatpush1.bf16.msra.mxu0 %v3931_v37  ;;  %v1033_v37 = vand.u32 4294901760, %v104_v10 }
  0xa9   :  { %3934 = vmatprep.subr.bf16.mxu0 %v3933_v38  ;;  %v1037_v38 = vand.u32 4294901760, %v106_v61 }
  0xac   :  { %3936 = vmatpush1.bf16.msra.mxu0 %v3935_v40 }
  0xad   :  { %3938 = vmatprep.subr.bf16.mxu0 %v3937_v41  ;;  %v1039_v41 = vand.u32 4294901760, %v109_v28 }
  0xb0   :  { %3940 = vmatpush1.bf16.msra.mxu0 %v3939_v50  ;;  %v1043_v50 = vand.u32 4294901760, %v111_v55 }
  0xb1   :  { %3942 = vmatprep.subr.bf16.mxu0 %v3941_v51  ;;  %v108_v51 = vld [vmem:[#allocation7 + $0x60] sm:$0xff] }
  0xb4   :  { %3944 = vmatpush1.bf16.msra.mxu0 %v3943_v52  ;;  %v110_v52 = vld [vmem:[#allocation7 + $0x70] sm:$0xff] }
  0xb5   :  { %3946 = vmatprep.subr.bf16.mxu0 %v3945_v58  ;;  %v115_v58 = vld [vmem:[#allocation7 + $0x98] sm:$0xff] }
  0xb8   :  { %3948 = vmatpush1.bf16.msra.mxu0 %v3947_v1  ;;  %v5294_v1 = vpack.c.bf16 %v1037_v38, %v1033_v37 }
  0xb9   :  { %3950 = vmatprep.subr.bf16.mxu0 %v3949_v2  ;;  %v1041_v2 = vand.u32 4294901760, %v108_v51 }
  0xba   :  { %6443 = vst [vmem:[#allocation31_spill] sm:$0xff] %v5294_v1 }
  0xbc   :  { %3952 = vmatpush1.bf16.msra.mxu0 %v3951_v15  ;;  %v1045_v15 = vand.u32 4294901760, %v110_v52 }
  0xbd   :  { %3954 = vmatprep.subr.bf16.mxu0 %v6422_v17 }
  0xbe   :  { %v5322_v25 = vpack.c.bf16 %v1045_v15, %v1041_v2 }
  0xbf   :  { %631 = vmatmul.mubr.f32.vlgmr.msra.gmra.mrb[0].mxu0 %v6423_v18  ;;  %v114_v18 = vld [vmem:[#allocation7 + $0x90] sm:$0xff] }
  0xc0   :  { %3956 = vmatpush1.bf16.msra.mxu0 %v6424_v19  ;;  %733 = vmatprep.mubr.f32.mxu0 %v6418_v39  ;;  %6446 = vst [vmem:[#allocation33_spill] sm:$0xff] %v5322_v25 }
  0xc1   :  { %3958 = vmatprep.subr.bf16.mxu0 %v6425_v23 }
  0xc4   :  { %3960 = vmatpush1.bf16.msra.mxu0 %v6426_v27 }
  0xc5   :  { %3962 = vmatprep.subr.bf16.mxu0 %v6427_v29 }
  0xc8   :  { %3964 = vmatpush1.bf16.msra.mxu0 %v6428_v30 }
  0xc9   :  { %3966 = vmatprep.subr.bf16.mxu0 %v6429_v33 }
  0xcc   :  { %3968 = vmatpush1.bf16.msra.mxu0 %v6430_v34 }
  0xcd   :  { %3970 = vmatprep.subr.bf16.mxu0 %v6431_v44 }
  0xd0   :  { %3972 = vmatpush1.bf16.msra.mxu0 %v6432_v3 }
  0xd1   :  { %3974 = vmatprep.subr.bf16.mxu0 %v6433_v24 }
  0xd4   :  { %3976 = vmatpush1.bf16.msra.mxu0 %v6434_v35 }
  0xd5   :  { %3978 = vmatprep.subr.bf16.mxu0 %v6435_v0 }
  0xd8   :  { %3980 = vmatpush1.bf16.msra.mxu0 %v6436_v8 }
  0xd9   :  { %3982 = vmatprep.subr.bf16.mxu0 %v6437_v47 }
  0xdc   :  { %3984 = vmatpush1.bf16.msra.mxu0 %v6438_v54 }
  0xdd   :  { %3986 = vmatprep.subr.bf16.mxu0 %v5105_v63  ;;  %v96_v63 = vld [vmem:[#allocation7] sm:$0xff] }
  0xdf   :  { %737 = vmatmul.mubr.f32.vlgmr.msra.gmra.mrb[0].mxu0 %v6439_v26  ;;  %v5316_v26 = vsub.f32 %v104_v10, %v1033_v37 }
  0xe0   :  { %3988 = vmatpush1.bf16.msra.mxu0 %v5111_v9  ;;  %903 = vmatprep.mubr.f32.mxu0 %v6418_v39  ;;  %v98_v9 = vld [vmem:[#allocation7 + $0x10] sm:$0xff] }
  0xe1   :  { %3990 = vmatprep.subr.bf16.mxu0 %v5117_v49  ;;  %v101_v49 = vld [vmem:[#allocation7 + $0x28] sm:$0xff] }
  0xe4   :  { %3992 = vmatpush1.bf16.msra.mxu0 %v5123_v43  ;;  %v103_v43 = vld [vmem:[#allocation7 + $0x38] sm:$0xff] }
  0xe5   :  { %3994 = vmatprep.subr.bf16.mxu0 %v5129_v11  ;;  %v1017_v11 = vand.u32 4294901760, %v96_v63  ;;  %v1027_v62 = vand.u32 4294901760, %v103_v43 }
  0xe7   :  { %v5291_v60 = vsub.f32 %v96_v63, %v1017_v11 }
  0xe8   :  { %3996 = vmatpush1.bf16.msra.mxu0 %v5135_v14  ;;  %v1021_v14 = vand.u32 4294901760, %v98_v9 }
  0xe9   :  { %3998 = vmatprep.subr.bf16.mxu0 %v5141_v56  ;;  %v5271_v56 = vpack.c.bf16 %v1019_v31, %v1015_v45  ;;  %v118_v45 = vld [vmem:[#allocation7 + $0xb0] sm:$0xff] }
  0xea   :  { %v5274_v16 = vpack.c.bf16 %v1021_v14, %v1017_v11  ;;  %v5331_v11 = vsub.f32 %v110_v52, %v1045_v15 }
  0xec   :  { %4000 = vmatpush1.bf16.msra.mxu0 %v5147_v53  ;;  %v1023_v53 = vand.u32 4294901760, %v101_v49 }
  0xed   :  { %4002 = vmatprep.subr.bf16.mxu0 %v6440_v32  ;;  %v5318_v32 = vsub.f32 %v106_v61, %v1037_v38  ;;  %v6311_v61 = vand.u32 4294901760, %v5287_v59 }
  0xf0   :  { %4004 = vmatpush1.bf16.msra.mxu0 %v6441_v13  ;;  %v5320_v13 = vsub.f32 %v109_v28, %v1039_v41 }
  0xf1   :  { %4006 = vmatprep.subr.bf16.mxu0 %v5165_v4  ;;  %v102_v4 = vld [vmem:[#allocation7 + $0x30] sm:$0xff] }
  0xf4   :  { %4008 = vmatpush1.bf16.msra.mxu0 %v5171_v6  ;;  %v107_v6 = vld [vmem:[#allocation7 + $0x58] sm:$0xff] }
  0xf5   :  { %4010 = vmatprep.subr.bf16.mxu0 %v5175_v20  ;;  %v1035_v42 = vand.u32 4294901760, %v107_v6 }
  0xf7   :  { %v5285_v40 = vpack.c.bf16 %v1035_v42, %v1031_v7 }
  0xf8   :  { %4012 = vmatpush1.bf16.msra.mxu0 %v5177_v22  ;;  %v1029_v22 = vand.u32 4294901760, %v102_v4 }
  0xf9   :  { %4014 = vmatprep.subr.bf16.mxu0 %v5179_v46  ;;  %v5277_v46 = vpack.c.bf16 %v1027_v62, %v1023_v53  ;;  %6442 = vst [vmem:[#allocation29_spill] sm:$0xff] %v5285_v40 }
  0xfc   :  { %4016 = vmatpush1.bf16.msra.mxu0 %v5181_v12  ;;  %v100_v12 = vld [vmem:[#allocation7 + $0x20] sm:$0xff] }
  0xfd   :  { %4018 = vmatprep.subr.bf16.mxu0 %v6422_v17  ;;  %v1025_v20 = vand.u32 4294901760, %v100_v12  ;;  %v112_v17 = vld [vmem:[#allocation7 + $0x80] sm:$0xff] }
  0xff   :  { %905 = vmatmul.mubr.f32.vlgmr.msra.gmra.mrb[0].mxu0 %v4944_v48  ;;  %v5281_v36 = vpack.c.bf16 %v1029_v22, %v1025_v20 }
 0x100   :  { %4020 = vmatpush1.bf16.msra.mxu0 %v6424_v19  ;;  %1007 = vmatprep.mubr.f32.mxu0 %v6418_v39  ;;  %v5296_v19 = vsub.f32 %v98_v9, %v1021_v14 }
 0x101   :  { %4022 = vmatprep.subr.bf16.mxu0 %v6425_v23  ;;  %v5299_v23 = vpack.c.bf16 %v1043_v50, %v1039_v41 }
 0x103   :  { %6444 = vst [vmem:[#allocation32_spill] sm:$0xff] %v5299_v23 }
 0x104   :  { %4024 = vmatpush1.bf16.msra.mxu0 %v6426_v27  ;;  %v1047_v27 = vand.u32 4294901760, %v113_v57 }
 0x105   :  { %4026 = vmatprep.subr.bf16.mxu0 %v6427_v29  ;;  %v1051_v29 = vand.u32 4294901760, %v115_v58 }
 0x106   :  { %v5333_v14 = vsub.f32 %v113_v57, %v1047_v27  ;;  %v5362_v57 = vld [vmem:[#allocation7 + $0xe8] sm:$0xff] }
 0x107   :  { %v5327_v63 = vpack.c.bf16 %v1051_v29, %v1047_v27  ;;  %v5376_v27 = vld [vmem:[#allocation7 + $0xf0] sm:$0xff] }
 0x108   :  { %4028 = vmatpush1.bf16.msra.mxu0 %v6428_v30  ;;  %v5301_v30 = vsub.f32 %v101_v49, %v1023_v53  ;;  %v121_v53 = vld [vmem:[#allocation7 + $0xc8] sm:$0xff] }
 0x109   :  { %4030 = vmatprep.subr.bf16.mxu0 %v6429_v33  ;;  %v5303_v33 = vsub.f32 %v103_v43, %v1027_v62  ;;  %6447 = vst [vmem:[#allocation17_spill] sm:$0xff] %v5327_v63  ;;  %v5329_v43 = vsub.f32 %v108_v51, %v1041_v2  ;;  %v123_v62 = vld [vmem:[#allocation7 + $0xd8] sm:$0xff]  ;;  %v1063_v38 = vand.u32 4294901760, %v121_v53 }
 0x10a   :  { %v1067_v41 = vand.u32 4294901760, %v123_v62 }
 0x10c   :  { %4032 = vmatpush1.bf16.msra.mxu0 %v6430_v34  ;;  %v5305_v34 = vsub.f32 %v100_v12, %v1025_v20  ;;  %v1061_v20 = vand.u32 4294901760, %v118_v45 }
 0x10d   :  { %4034 = vmatprep.subr.bf16.mxu0 %v6431_v44  ;;  %v5307_v44 = vsub.f32 %v102_v4, %v1029_v22  ;;  %v5338_v4 = vsub.f32 %v115_v58, %v1051_v29  ;;  %v5342_v22 = vld [vmem:[#allocation7 + $0xc0] sm:$0xff]  ;;  %v5364_v58 = vld [vmem:[#allocation7 + $0xf8] sm:$0xff]  ;;  %v6317_v29 = vand.u32 4294901760, %v5291_v60 }
 0x10e   :  { %v1065_v51 = vand.u32 4294901760, %v5342_v22 }
 0x110   :  { %4036 = vmatpush1.bf16.msra.mxu0 %v6432_v3  ;;  %v117_v3 = vld [vmem:[#allocation7 + $0xa8] sm:$0xff] }
 0x111   :  { %4038 = vmatprep.subr.bf16.mxu0 %v6433_v24  ;;  %v119_v24 = vld [vmem:[#allocation7 + $0xb8] sm:$0xff]  ;;  %v1055_v9 = vand.u32 4294901760, %v117_v3 }
 0x112   :  { %v1059_v49 = vand.u32 4294901760, %v119_v24 }
 0x113   :  { %v5356_v37 = vsub.f32 %v117_v3, %v1055_v9 }
 0x114   :  { %4040 = vmatpush1.bf16.msra.mxu0 %v6434_v35  ;;  %v5309_v35 = vsub.f32 %v105_v5, %v1031_v7  ;;  %v5344_v7 = vld [vmem:[#allocation7 + $0xd0] sm:$0xff] }
 0x115   :  { %4042 = vmatprep.subr.bf16.mxu0 %v6435_v0  ;;  %v5311_v0 = vsub.f32 %v107_v6, %v1035_v42  ;;  %v6314_v52 = vand.u32 4294901760, %v5344_v7 }
 0x118   :  { %4044 = vmatpush1.bf16.msra.mxu0 %v6436_v8  ;;  %v1049_v8 = vand.u32 4294901760, %v112_v17 }
 0x119   :  { %4046 = vmatprep.subr.bf16.mxu0 %v6437_v47  ;;  %v1053_v47 = vand.u32 4294901760, %v114_v18 }
 0x11a   :  { %v5347_v42 = vsub.f32 %v112_v17, %v1049_v8 }
 0x11b   :  { %v5340_v5 = vpack.c.bf16 %v1053_v47, %v1049_v8  ;;  %v5349_v10 = vsub.f32 %v114_v18, %v1053_v47  ;;  %v5374_v18 = vld [vmem:[#allocation7 + $0xe0] sm:$0xff]  ;;  %v6454_v47 = vand.u32 4294901760, %v5301_v30 }
 0x11c   :  { %4048 = vmatpush1.bf16.msra.mxu0 %v6438_v54  ;;  %v5313_v54 = vld [vmem:[#allocation2] sm:$0xff] }
 0x11d   :  { %4050 = vmatprep.subr.bf16.mxu0 %v5271_v56  ;;  %6445 = vst [vmem:[#allocation16_spill] sm:$0xff] %v5313_v54  ;;  %v5336_v12 = vand.u32 4294901760, %v5313_v54  ;;  %6448 = vst [vmem:[#allocation18_spill] sm:$0xff] %v5340_v5 }
 0x11f   :  { %1009 = vmatmul.mubr.f32.vlgmr.msra.gmra.mrb[0].mxu0 %v4944_v48  ;;  %v5289_v48 = vsub.f32 %v99_v21, %v1019_v31  ;;  %v116_v21 = vld [vmem:[#allocation7 + $0xa0] sm:$0xff]  ;;  %v5325_v31 = vsub.f32 %v111_v55, %v1043_v50  ;;  %v5354_v55 = vpack.c.bf16 %v1059_v49, %v1055_v9  ;;  %v5358_v50 = vsub.f32 %v119_v24, %v1059_v49 }
 0x120   :  { %4052 = vmatpush1.bf16.msra.mxu0 %v5274_v16  ;;  %1111 = vmatprep.mubr.f32.mxu0 %v6418_v39  ;;  %v1057_v6 = vand.u32 4294901760, %v116_v21  ;;  %v5368_v2 = vsub.f32 %v5313_v54, %v5336_v12  ;;  %v1126_v24 = vsub.f32 %v5287_v59, %v6311_v61  ;;  %v5390_v9 = vsub.f32 %v118_v45, %v1061_v20 }
 0x121   :  { %4054 = vmatprep.subr.bf16.mxu0 %v5277_v46  ;;  %v6312_v28 = vand.u32 4294901760, %v5289_v48  ;;  %6449 = vst [vmem:[#allocation19_spill] sm:$0xff] %v5354_v55  ;;  %v5392_v49 = vpack.c.bf16 %v1067_v41, %v1063_v38  ;;  %v5398_v61 = vpack.c.bf16 %v6314_v52, %v1065_v51  ;;  %v1132_v45 = vsub.f32 %v5291_v60, %v6317_v29 }
 0x122   :  { %v5370_v15 = vpack.c.bf16 %v1061_v20, %v1057_v6  ;;  %v5372_v17 = vsub.f32 %v116_v21, %v1057_v6  ;;  %v6453_v20 = vand.u32 4294901760, %v5296_v19  ;;  %v1127_v52 = vand.u32 4294901760, %v1126_v24 }
 0x123   :  { %v1138_v8 = vsub.f32 %v5289_v48, %v6312_v28  ;;  %6451 = vst [vmem:[#allocation21_spill] sm:$0xff] %v5392_v49  ;;  %6452 = vst [vmem:[#allocation22_spill] sm:$0xff] %v5398_v61  ;;  %v1150_v21 = vsub.f32 %v5301_v30, %v6454_v47  ;;  %v6457_v54 = vand.u32 4294901760, %v5364_v58  ;;  %v6332_v24 = vand.u32 4294901760, %v5309_v35 }
 0x124   :  { %4056 = vmatpush1.bf16.msra.mxu0 %v5281_v36  ;;  %6450 = vst [vmem:[#allocation20_spill] sm:$0xff] %v5370_v15  ;;  %v1144_v6 = vsub.f32 %v5296_v19, %v6453_v20  ;;  %v6456_v20 = vand.u32 4294901760, %v5362_v57  ;;  %v6459_v47 = vand.u32 4294901760, %v5368_v2 }
 0x125   :  { %4058 = vmatprep.subr.bf16.mxu0 %v5285_v40  ;;  %v1139_v28 = vand.u32 4294901760, %v1138_v8  ;;  %v6467_v40 = vand.u32 4294901760, %v5320_v13 }
 0x126   :  { %v5425_v3 = vpack.c.bf16 %v6457_v54, %v6456_v20  ;;  %v6461_v20 = vand.u32 4294901760, %v5307_v44 }
 0x128   :  { %4060 = vmatpush1.bf16.msra.mxu0 %v5294_v1  ;;  %6458 = vst [vmem:[#allocation23_spill] sm:$0xff] %v5425_v3  ;;  %v1168_v8 = vsub.f32 %v5307_v44, %v6461_v20 }
 0x129   :  { %4062 = vmatprep.subr.bf16.mxu0 %v5299_v23 }
 0x12a   :  { %v1169_v1 = vand.u32 4294901760, %v1168_v8  ;;  %v6468_v8 = vand.u32 4294901760, %v5325_v31 }
 0x12c   :  { %4064 = vmatpush1.bf16.msra.mxu0 %v5322_v25  ;;  %v6460_v25 = vand.u32 4294901760, %v5305_v34 }
 0x12d   :  { %4066 = vmatprep.subr.bf16.mxu0 %v5327_v63  ;;  %v1145_v63 = vand.u32 4294901760, %v1144_v6  ;;  %v6464_v6 = vand.u32 4294901760, %v5311_v0 }
 0x12e   :  { %v1156_v54 = vsub.f32 %v5305_v34, %v6460_v25  ;;  %v1174_v25 = vsub.f32 %v5309_v35, %v6332_v24 }
 0x12f   :  { %v1186_v20 = vsub.f32 %v5311_v0, %v6464_v6  ;;  %v6339_v6 = vand.u32 4294901760, %v5329_v43 }
 0x130   :  { %4068 = vmatpush1.bf16.msra.mxu0 %v5340_v5  ;;  %v5419_v5 = vsub.f32 %v121_v53, %v1063_v38  ;;  %v1133_v38 = vand.u32 4294901760, %v1132_v45  ;;  %v1151_v53 = vand.u32 4294901760, %v1150_v21  ;;  %v6466_v21 = vand.u32 4294901760, %v5318_v32 }
 0x131   :  { %4070 = vmatprep.subr.bf16.mxu0 %v5354_v55  ;;  %v6455_v55 = vand.u32 4294901760, %v5303_v33 }
 0x132   :  { %v4083_v24 = vpack.c.bf16 %v1145_v63, %v1133_v38  ;;  %v1198_v63 = vsub.f32 %v5320_v13, %v6467_v40  ;;  %v1210_v38 = vsub.f32 %v5325_v31, %v6468_v8 }
 0x133   :  { %v1162_v29 = vsub.f32 %v5303_v33, %v6455_v55  ;;  %v1115_v55 = vsub.f32 %v5368_v2, %v6459_v47 }
 0x134   :  { %4072 = vmatpush1.bf16.msra.mxu0 %v5370_v15  ;;  %v5429_v15 = vsub.f32 %v123_v62, %v1067_v41  ;;  %v6462_v62 = vand.u32 4294901760, %v5374_v18  ;;  %v6463_v41 = vand.u32 4294901760, %v5376_v27  ;;  %v1199_v8 = vand.u32 4294901760, %v1198_v63 }
 0x135   :  { %4074 = vmatprep.subr.bf16.mxu0 %v5392_v49  ;;  %v4081_v49 = vpack.c.bf16 %v1139_v28, %v1127_v52  ;;  %v1163_v45 = vand.u32 4294901760, %v1162_v29  ;;  %v1116_v28 = vand.u32 4294901760, %v1115_v55  ;;  %v6465_v52 = vand.u32 4294901760, %v5316_v26 }
 0x136   :  { %v5447_v47 = vpack.c.bf16 %v6463_v41, %v6462_v62  ;;  %v5459_v62 = vsub.f32 %v5342_v22, %v1065_v51  ;;  %v1192_v41 = vsub.f32 %v5318_v32, %v6466_v21  ;;  %v6340_v22 = vand.u32 4294901760, %v5331_v11 }
 0x137   :  { %v1180_v29 = vsub.f32 %v5316_v26, %v6465_v52  ;;  %v4085_v23 = vpack.c.bf16 %v1163_v45, %v1151_v53  ;;  %v6341_v55 = vand.u32 4294901760, %v5338_v4  ;;  %v1175_v52 = vand.u32 4294901760, %v1174_v25 }
 0x138   :  { %4076 = vmatpush1.bf16.msra.mxu0 %v5398_v61  ;;  %v1187_v61 = vand.u32 4294901760, %v1186_v20  ;;  %v1193_v21 = vand.u32 4294901760, %v1192_v41  ;;  %v6343_v53 = vand.u32 4294901760, %v5347_v42  ;;  %v6342_v45 = vand.u32 4294901760, %v5349_v10 }
 0x139   :  { %4078 = vmatprep.subr.bf16.mxu0 %v5425_v3  ;;  %v1157_v3 = vand.u32 4294901760, %v1156_v54  ;;  %v1181_v54 = vand.u32 4294901760, %v1180_v29  ;;  %v1216_v20 = vsub.f32 %v5331_v11, %v6340_v22  ;;  %v6469_v29 = vand.u32 4294901760, %v5333_v14 }
 0x13a   :  { %v6471_v22 = vand.u32 4294901760, %v5362_v57  ;;  %v1240_v25 = vsub.f32 %v5349_v10, %v6342_v45 }
 0x13b   :  { %v4087_v51 = vpack.c.bf16 %v1169_v1, %v1157_v3  ;;  %v1222_v41 = vsub.f32 %v5333_v14, %v6469_v29  ;;  %v1234_v1 = vsub.f32 %v5338_v4, %v6341_v55  ;;  %v6470_v3 = vand.u32 4294901760, %v5344_v7 }
 0x13c   :  { %4080 = vmatpush1.bf16.msra.mxu0 %v5447_v47  ;;  %v5503_v40 = vsub.f32 %v5362_v57, %v6471_v22  ;;  %v4091_v29 = vpack.c.bf16 %v1193_v21, %v1181_v54  ;;  %v1228_v55 = vsub.f32 %v5347_v42, %v6343_v53  ;;  %v6344_v53 = vand.u32 4294901760, %v5419_v5 }
 0x13d   :  { %4082 = vmatprep.subr.bf16.mxu0 %v4081_v49  ;;  %v1204_v49 = vsub.f32 %v5329_v43, %v6339_v6  ;;  %v1211_v6 = vand.u32 4294901760, %v1210_v38  ;;  %v1217_v38 = vand.u32 4294901760, %v1216_v20  ;;  %v1223_v54 = vand.u32 4294901760, %v1222_v41 }
 0x13e   :  { %v1235_v21 = vand.u32 4294901760, %v1234_v1  ;;  %v6475_v57 = vand.u32 4294901760, %v5374_v18  ;;  %v1229_v20 = vand.u32 4294901760, %v1228_v55  ;;  %v1241_v41 = vand.u32 4294901760, %v1240_v25 }
 0x13f   :  { %1117 = vmatmul.mubr.f32.vlgmr.msra.gmra.mrb[0].mxu0 %v1116_v28  ;;  %v5498_v28 = vsub.f32 %v5344_v7, %v6470_v3  ;;  %v6472_v7 = vand.u32 4294901760, %v5356_v37  ;;  %v1205_v63 = vand.u32 4294901760, %v1204_v49  ;;  %v6474_v3 = vand.u32 4294901760, %v5364_v58 }
 0x140   :  { %4084 = vmatpush1.bf16.msra.mxu0 %v4083_v24  ;;  %1347 = vmatprep.mubr.f32.mxu0 %v6418_v39  ;;  %v4089_v24 = vpack.c.bf16 %v1187_v61, %v1175_v52  ;;  %v6473_v61 = vand.u32 4294901760, %v5358_v50  ;;  %v5529_v22 = vsub.f32 %v5374_v18, %v6475_v57  ;;  %v4097_v57 = vpack.c.bf16 %v1235_v21, %v1223_v54 }
 0x141   :  { %4086 = vmatprep.subr.bf16.mxu0 %v4085_v23  ;;  %v1246_v23 = vsub.f32 %v5356_v37, %v6472_v7  ;;  %v5522_v45 = vsub.f32 %v5364_v58, %v6474_v3  ;;  %v4093_v7 = vpack.c.bf16 %v1211_v6, %v1199_v8  ;;  %v6477_v6 = vand.u32 4294901760, %v5372_v17 }
 0x142   :  { %v1258_v52 = vsub.f32 %v5358_v50, %v6473_v61  ;;  %v6478_v8 = vand.u32 4294901760, %v5390_v9  ;;  %v4095_v18 = vpack.c.bf16 %v1217_v38, %v1205_v63  ;;  %v1275_v61 = vand.u32 4294901760, %v5459_v62 }
 0x143   :  { %v1247_v58 = vand.u32 4294901760, %v1246_v23  ;;  %v1270_v55 = vsub.f32 %v5419_v5, %v6344_v53  ;;  %v6479_v25 = vand.u32 4294901760, %v5429_v15 }
 0x144   :  { %4088 = vmatpush1.bf16.msra.mxu0 %v4087_v51  ;;  %v6476_v51 = vand.u32 4294901760, %v5376_v27  ;;  %v1259_v1 = vand.u32 4294901760, %v1258_v52  ;;  %v1264_v3 = vsub.f32 %v5390_v9, %v6478_v8  ;;  %v6345_v52 = vand.u32 4294901760, %v5503_v40 }
 0x145   :  { %4090 = vmatprep.subr.bf16.mxu0 %v4089_v24  ;;  %v1252_v24 = vsub.f32 %v5372_v17, %v6477_v6  ;;  %v1282_v23 = vsub.f32 %v5429_v15, %v6479_v25  ;;  %v1276_v21 = vsub.f32 %v5459_v62, %v1275_v61  ;;  %v1299_v6 = vand.u32 4294901760, %v5529_v22 }
 0x146   :  { %v5534_v49 = vsub.f32 %v5376_v27, %v6476_v51  ;;  %v6346_v27 = vand.u32 4294901760, %v5498_v28  ;;  %v6347_v51 = vand.u32 4294901760, %v5522_v45  ;;  %v4101_v63 = vpack.c.bf16 %v1259_v1, %v1247_v58 }
 0x147   :  { %v1253_v38 = vand.u32 4294901760, %v1252_v24  ;;  %v1265_v54 = vand.u32 4294901760, %v1264_v3  ;;  %v1271_v25 = vand.u32 4294901760, %v1270_v55  ;;  %v1283_v53 = vand.u32 4294901760, %v1282_v23 }
 0x148   :  { %4092 = vmatpush1.bf16.msra.mxu0 %v4091_v29  ;;  %v4099_v29 = vpack.c.bf16 %v1241_v41, %v1229_v20  ;;  %v1311_v8 = vand.u32 4294901760, %v5534_v49  ;;  %v1294_v20 = vsub.f32 %v5503_v40, %v6345_v52  ;;  %v1306_v41 = vsub.f32 %v5522_v45, %v6347_v51 }
 0x149   :  { %4094 = vmatprep.subr.bf16.mxu0 %v4093_v7  ;;  %v1288_v7 = vsub.f32 %v5498_v28, %v6346_v27  ;;  %v4103_v58 = vpack.c.bf16 %v1265_v54, %v1253_v38  ;;  %v1277_v1 = vand.u32 4294901760, %v1276_v21  ;;  %v1300_v3 = vsub.f32 %v5529_v22, %v1299_v6 }
 0x14a   :  { %v1295_v55 = vand.u32 4294901760, %v1294_v20  ;;  %v1307_v23 = vand.u32 4294901760, %v1306_v41  ;;  %v4113_v54 = vpack.c.bf16 %v5289_v48, %v5287_v59  ;;  %v4115_v21 = vpack.c.bf16 %v5296_v19, %v5291_v60 }
 0x14b   :  { %v1289_v24 = vand.u32 4294901760, %v1288_v7  ;;  %v1301_v27 = vand.u32 4294901760, %v1300_v3  ;;  %v4127_v7 = vpack.c.bf16 %v5331_v11, %v5329_v43  ;;  %v4131_v20 = vpack.c.bf16 %v5349_v10, %v5347_v42 }
 0x14c   :  { %4096 = vmatpush1.bf16.msra.mxu0 %v4095_v18  ;;  %v1312_v18 = vsub.f32 %v5534_v49, %v1311_v8  ;;  %v4133_v41 = vpack.c.bf16 %v5358_v50, %v5356_v37  ;;  %v4141_v3 = vpack.c.bf16 %v5522_v45, %v5503_v40 }
 0x14d   :  { %4098 = vmatprep.subr.bf16.mxu0 %v4097_v57  ;;  %v4105_v57 = vpack.c.bf16 %v1283_v53, %v1271_v25  ;;  %v4107_v52 = vpack.c.bf16 %v1289_v24, %v1277_v1  ;;  %v4117_v53 = vpack.c.bf16 %v5303_v33, %v5301_v30  ;;  %v4129_v25 = vpack.c.bf16 %v5338_v4, %v5333_v14 }
 0x14e   :  { %v1313_v51 = vand.u32 4294901760, %v1312_v18  ;;  %v4137_v1 = vpack.c.bf16 %v5429_v15, %v5419_v5  ;;  %v4139_v24 = vpack.c.bf16 %v5498_v28, %v5459_v62  ;;  %v4143_v18 = vpack.c.bf16 %v5534_v49, %v5529_v22  ;;  %v1897_v62 = vld [vmem:[#allocation10 + $0x10] sm:$0xff]  ;;  %v1900_v22 = vld [vmem:[#allocation10 + $0x28] sm:$0xff] }
 0x14f   :  { %v1927_v49 = vand.u32 4294901760, %v1900_v22 }
 0x150   :  { %4100 = vmatpush1.bf16.msra.mxu0 %v4099_v29  ;;  %v4109_v29 = vpack.c.bf16 %v1307_v23, %v1295_v55  ;;  %v4111_v38 = vpack.c.bf16 %v1313_v51, %v1301_v27  ;;  %v4121_v27 = vpack.c.bf16 %v5311_v0, %v5309_v35  ;;  %v4125_v51 = vpack.c.bf16 %v5325_v31, %v5320_v13  ;;  %v6481_v55 = vld [vmem:[#allocation31_spill] sm:$0xff]  ;;  %v6482_v23 = vld [vmem:[#allocation32_spill] sm:$0xff] }
 0x151   :  { %4102 = vmatprep.subr.bf16.mxu0 %v4101_v63  ;;  %v4119_v63 = vpack.c.bf16 %v5307_v44, %v5305_v34 }
 0x154   :  { %4104 = vmatpush1.bf16.msra.mxu0 %v4103_v58  ;;  %v4135_v58 = vpack.c.bf16 %v5390_v9, %v5372_v17 }
 0x155   :  { %4106 = vmatprep.subr.bf16.mxu0 %v4105_v57  ;;  %v6480_v57 = vld [vmem:[#allocation29_spill] sm:$0xff] }
 0x158   :  { %4108 = vmatpush1.bf16.msra.mxu0 %v4107_v52  ;;  %v4123_v52 = vpack.c.bf16 %v5318_v32, %v5316_v26 }
 0x159   :  { %4110 = vmatprep.subr.bf16.mxu0 %v4109_v29  ;;  %v6483_v29 = vld [vmem:[#allocation33_spill] sm:$0xff] }
 0x15c   :  { %4112 = vmatpush1.bf16.msra.mxu0 %v4111_v38  ;;  %v6484_v38 = vld [vmem:[#allocation17_spill] sm:$0xff] }
 0x15d   :  { %4114 = vmatprep.subr.bf16.mxu0 %v4113_v54  ;;  %v6485_v54 = vld [vmem:[#allocation18_spill] sm:$0xff] }
 0x15f   :  { %1349 = vmatmul.mubr.f32.vlgmr.msra.gmra.mrb[0].mxu0 %v5336_v12 }
 0x160   :  { %4116 = vmatpush1.bf16.msra.mxu0 %v4115_v21  ;;  %1483 = vmatprep.mubr.f32.mxu0 %v6418_v39  ;;  %v6486_v21 = vld [vmem:[#allocation19_spill] sm:$0xff] }
 0x161   :  { %4118 = vmatprep.subr.bf16.mxu0 %v4117_v53  ;;  %v6487_v53 = vld [vmem:[#allocation20_spill] sm:$0xff] }
 0x164   :  { %4120 = vmatpush1.bf16.msra.mxu0 %v4119_v63  ;;  %v6488_v63 = vld [vmem:[#allocation21_spill] sm:$0xff] }
 0x165   :  { %4122 = vmatprep.subr.bf16.mxu0 %v4121_v27  ;;  %v6489_v27 = vld [vmem:[#allocation22_spill] sm:$0xff] }
 0x168   :  { %4124 = vmatpush1.bf16.msra.mxu0 %v4123_v52  ;;  %v6490_v52 = vld [vmem:[#allocation23_spill] sm:$0xff] }
 0x169   :  { %4126 = vmatprep.subr.bf16.mxu0 %v4125_v51  ;;  %v6491_v51 = vand.u32 4294901760, %v5287_v59  ;;  %v6498_v59 = vand.u32 4294901760, %v5305_v34  ;;  %v6504_v34 = vand.u32 4294901760, %v5320_v13  ;;  %v6511_v13 = vand.u32 4294901760, %v5349_v10 }
 0x16a   :  { %v6518_v10 = vand.u32 4294901760, %v5498_v28 }
 0x16c   :  { %4128 = vmatpush1.bf16.msra.mxu0 %v4127_v7  ;;  %v6492_v7 = vand.u32 4294901760, %v5289_v48  ;;  %v6499_v48 = vand.u32 4294901760, %v5307_v44  ;;  %v6505_v44 = vand.u32 4294901760, %v5325_v31  ;;  %v6512_v31 = vand.u32 4294901760, %v5356_v37 }
 0x16d   :  { %4130 = vmatprep.subr.bf16.mxu0 %v4129_v25  ;;  %v4203_v37 = vpack.c.bf16 %v6518_v10, %v1275_v61  ;;  %v5815_v10 = vsub.f32 %v1900_v22, %v1927_v49 }
 0x16e   :  { %v4177_v25 = vpack.c.bf16 %v6492_v7, %v6491_v51  ;;  %v4183_v51 = vpack.c.bf16 %v6499_v48, %v6498_v59 }
 0x170   :  { %4132 = vmatpush1.bf16.msra.mxu0 %v4131_v20  ;;  %v6493_v20 = vand.u32 4294901760, %v5291_v60  ;;  %v6500_v60 = vand.u32 4294901760, %v5309_v35  ;;  %v6507_v35 = vand.u32 4294901760, %v5331_v11  ;;  %v6514_v11 = vand.u32 4294901760, %v5372_v17 }
 0x171   :  { %4134 = vmatprep.subr.bf16.mxu0 %v4133_v41  ;;  %v6494_v41 = vand.u32 4294901760, %v5296_v19  ;;  %v6501_v19 = vand.u32 4294901760, %v5311_v0  ;;  %v6508_v0 = vand.u32 4294901760, %v5333_v14  ;;  %v6515_v14 = vand.u32 4294901760, %v5390_v9 }
 0x172   :  { %v6520_v17 = vand.u32 4294901760, %v5522_v45  ;;  %v4742_v9 = vmov 0.0|0.0   ;;  %v1898_v45 = vld [vmem:[#allocation10 + $0x18] sm:$0xff] }
 0x173   :  { %4241 = vmatprep.subr.bf16.mxu1 %v4742_v9  ;;  %v1921_v28 = vand.u32 4294901760, %v1898_v45 }
 0x174   :  { %4136 = vmatpush1.bf16.msra.mxu0 %v4135_v58  ;;  %v4179_v58 = vpack.c.bf16 %v6494_v41, %v6493_v20  ;;  %v6506_v20 = vand.u32 4294901760, %v5329_v43  ;;  %v6513_v43 = vand.u32 4294901760, %v5358_v50  ;;  %v6519_v50 = vand.u32 4294901760, %v5503_v40 }
 0x175   :  { %4138 = vmatprep.subr.bf16.mxu0 %v4137_v1  ;;  %v6495_v1 = vand.u32 4294901760, %v5301_v30  ;;  %v4185_v30 = vpack.c.bf16 %v6501_v19, %v6500_v60  ;;  %v1918_v40 = vand.u32 4294901760, %v1897_v62  ;;  %v5755_v19 = vld [vmem:[#allocation10 + $0x60] sm:$0xff] }
 0x176   :  { %v4191_v41 = vpack.c.bf16 %v6507_v35, %v6506_v20  ;;  %v4205_v59 = vpack.c.bf16 %v6520_v17, %v6519_v50 }
 0x178   :  { %4140 = vmatpush1.bf16.msra.mxu0 %v4139_v24  ;;  %v6496_v24 = vand.u32 4294901760, %v5303_v33  ;;  %v6502_v33 = vand.u32 4294901760, %v5316_v26  ;;  %v6509_v26 = vand.u32 4294901760, %v5338_v4  ;;  %v6516_v4 = vand.u32 4294901760, %v5419_v5 }
 0x179   :  { %4142 = vmatprep.subr.bf16.mxu0 %v4141_v3  ;;  %v4207_v5 = vpack.c.bf16 %v1311_v8, %v1299_v6  ;;  %v5721_v8 = vld [vmem:[#allocation10 + $0x30] sm:$0xff] }
 0x17a   :  { %v4181_v3 = vpack.c.bf16 %v6496_v24, %v6495_v1  ;;  %v4197_v24 = vpack.c.bf16 %v6513_v43, %v6512_v31  ;;  %v5799_v31 = vsub.f32 %v1898_v45, %v1921_v28 }
 0x17c   :  { %4144 = vmatpush1.bf16.msra.mxu0 %v4143_v18  ;;  %v6497_v18 = vand.u32 4294901760, %v5368_v2 }
 0x17d   :  { %4146 = vmatprep.subr.bf16.mxu0 %v5271_v56 }
 0x17f   :  { %1486 = vmatmul.mubr.f32.vlgmr.msra.gmra.mrb[0].mxu0 %v5368_v2  ;;  %v6503_v2 = vand.u32 4294901760, %v5318_v32  ;;  %v6510_v32 = vand.u32 4294901760, %v5347_v42  ;;  %v6517_v42 = vand.u32 4294901760, %v5429_v15 }
 0x180   :  { %4148 = vmatpush1.bf16.msra.mxu0 %v5274_v16  ;;  %1588 = vmatprep.mubr.f32.mxu0 %v6418_v39 }
 0x181   :  { %4150 = vmatprep.subr.bf16.mxu0 %v5277_v46  ;;  %v4187_v7 = vpack.c.bf16 %v6503_v2, %v6502_v33  ;;  %v4195_v1 = vpack.c.bf16 %v6511_v13, %v6510_v32  ;;  %v1948_v33 = vand.u32 4294901760, %v5755_v19 }
 0x184   :  { %4152 = vmatpush1.bf16.msra.mxu0 %v5281_v36 }
 0x185   :  { %4154 = vmatprep.subr.bf16.mxu0 %v6480_v57 }
 0x188   :  { %4156 = vmatpush1.bf16.msra.mxu0 %v6481_v55 }
 0x189   :  { %4158 = vmatprep.subr.bf16.mxu0 %v6482_v23 }
 0x18c   :  { %4160 = vmatpush1.bf16.msra.mxu0 %v6483_v29 }
 0x18d   :  { %4162 = vmatprep.subr.bf16.mxu0 %v6484_v38 }
 0x190   :  { %4164 = vmatpush1.bf16.msra.mxu0 %v6485_v54 }
 0x191   :  { %4166 = vmatprep.subr.bf16.mxu0 %v6486_v21 }
 0x194   :  { %4168 = vmatpush1.bf16.msra.mxu0 %v6487_v53 }
 0x195   :  { %4170 = vmatprep.subr.bf16.mxu0 %v6488_v63 }
 0x198   :  { %4172 = vmatpush1.bf16.msra.mxu0 %v6489_v27 }
 0x199   :  { %4174 = vmatprep.subr.bf16.mxu0 %v6490_v52 }
 0x19c   :  { %4176 = vmatpush1.bf16.msra.mxu0 %v5447_v47 }
 0x19d   :  { %4178 = vmatprep.subr.bf16.mxu0 %v4177_v25  ;;  %v4189_v25 = vpack.c.bf16 %v6505_v44, %v6504_v34  ;;  %v5769_v34 = vld [vmem:[#allocation10 + $0x70] sm:$0xff]  ;;  %v5771_v44 = vld [vmem:[#allocation10 + $0x78] sm:$0xff] }
 0x19e   :  { %v1954_v35 = vand.u32 4294901760, %v5769_v34 }
 0x19f   :  { %1592 = vmatmul.mubr.f32.vlgmr.msra.gmra.mrb[0].mxu0 %v6497_v18  ;;  %v4201_v18 = vpack.c.bf16 %v6517_v42, %v6516_v4 }
 0x1a0   :  { %4180 = vmatpush1.bf16.msra.mxu0 %v4179_v58  ;;  %1758 = vmatprep.mubr.f32.mxu0 %v6418_v39  ;;  %v4193_v58 = vpack.c.bf16 %v6509_v26, %v6508_v0 }
 0x1a1   :  { %4182 = vmatprep.subr.bf16.mxu0 %v4181_v3  ;;  %v4199_v3 = vpack.c.bf16 %v6515_v14, %v6514_v11  ;;  %v6360_v14 = vand.u32 4294901760, %v5799_v31 }
 0x1a3   :  { %v2027_v42 = vsub.f32 %v5799_v31, %v6360_v14  ;;  %v6521_v14 = vld [vmem:[#allocation16_spill] sm:$0xff] }
 0x1a4   :  { %4184 = vmatpush1.bf16.msra.mxu0 %v4183_v51 }
 0x1a5   :  { %4186 = vmatprep.subr.bf16.mxu0 %v4185_v30  ;;  %v5757_v30 = vld [vmem:[#allocation10 + $0x68] sm:$0xff]  ;;  %v2028_v50 = vand.u32 4294901760, %v2027_v42 }
 0x1a6   :  { %v1951_v2 = vand.u32 4294901760, %v5757_v30 }
 0x1a8   :  { %4188 = vmatpush1.bf16.msra.mxu0 %v4187_v7  ;;  %v5767_v7 = vpack.c.bf16 %v1951_v2, %v1948_v33 }
 0x1a9   :  { %4190 = vmatprep.subr.bf16.mxu0 %v4189_v25 }
 0x1ac   :  { %4192 = vmatpush1.bf16.msra.mxu0 %v4191_v41  ;;  %v1957_v41 = vand.u32 4294901760, %v5771_v44 }
 0x1ad   :  { %4194 = vmatprep.subr.bf16.mxu0 %v4193_v58 }
 0x1ae   :  { %v5789_v58 = vpack.c.bf16 %v1957_v41, %v1954_v35 }
 0x1b0   :  { %4196 = vmatpush1.bf16.msra.mxu0 %v4195_v1  ;;  %v5797_v1 = vsub.f32 %v1897_v62, %v1918_v40 }
 0x1b1   :  { %4198 = vmatprep.subr.bf16.mxu0 %v4197_v24 }
 0x1b2   :  { %v6361_v11 = vand.u32 4294901760, %v5797_v1 }
 0x1b4   :  { %4200 = vmatpush1.bf16.msra.mxu0 %v4199_v3  ;;  %v2020_v4 = vsub.f32 %v5797_v1, %v6361_v11 }
 0x1b5   :  { %4202 = vmatprep.subr.bf16.mxu0 %v4201_v18 }
 0x1b8   :  { %4204 = vmatpush1.bf16.msra.mxu0 %v4203_v37  ;;  %v2021_v37 = vand.u32 4294901760, %v2020_v4 }
 0x1b9   :  { %4206 = vmatprep.subr.bf16.mxu0 %v4205_v59  ;;  %v6358_v59 = vand.u32 4294901760, %v5815_v10 }
 0x1bc   :  { %4208 = vmatpush1.bf16.msra.mxu0 %v4207_v5  ;;  %v5819_v5 = vpack.c.bf16 %v2028_v50, %v2021_v37 }
 0x1bd   :  { %4210 = vmatprep.subr.bf16.mxu0 %v5271_v56  ;;  %v1895_v56 = vld [vmem:[#allocation10] sm:$0xff] }
 0x1bf   :  { %1760 = vmatmul.mubr.f32.vlgmr.msra.gmra.mrb[0].mxu0 %v5336_v12 }
 0x1c0   :  { %4212 = vmatpush1.bf16.msra.mxu0 %v5274_v16  ;;  %1862 = vmatprep.mubr.f32.mxu0 %v6418_v39  ;;  %v1896_v16 = vld [vmem:[#allocation10 + $0x8] sm:$0xff] }
 0x1c1   :  { %4214 = vmatprep.subr.bf16.mxu0 %v5277_v46  ;;  %v1912_v46 = vand.u32 4294901760, %v1895_v56 }
 0x1c3   :  { %v5773_v25 = vsub.f32 %v1895_v56, %v1912_v46 }
 0x1c4   :  { %4216 = vmatpush1.bf16.msra.mxu0 %v5281_v36  ;;  %v1915_v36 = vand.u32 4294901760, %v1896_v16 }
 0x1c5   :  { %4218 = vmatprep.subr.bf16.mxu0 %v6480_v57  ;;  %v5723_v57 = vld [vmem:[#allocation10 + $0x38] sm:$0xff]  ;;  %v2005_v0 = vand.u32 4294901760, %v5773_v25 }
 0x1c6   :  { %v5710_v15 = vpack.c.bf16 %v1915_v36, %v1912_v46  ;;  %v5775_v20 = vsub.f32 %v1896_v16, %v1915_v36  ;;  %v2041_v16 = vsub.f32 %v5815_v10, %v6358_v59 }
 0x1c7   :  { %v2006_v32 = vsub.f32 %v5773_v25, %v2005_v0 }
 0x1c8   :  { %4220 = vmatpush1.bf16.msra.mxu0 %v6481_v55  ;;  %4243 = vmatpush3.bf16.msra.mxu1 %v5710_v15  ;;  %v1930_v55 = vand.u32 4294901760, %v5721_v8  ;;  %v6362_v26 = vand.u32 4294901760, %v5775_v20  ;;  %v2042_v45 = vand.u32 4294901760, %v2041_v16 }
 0x1c9   :  { %4222 = vmatprep.subr.bf16.mxu0 %v6482_v23  ;;  %4244 = vmatprep.subr.bf16.mxu1 %v4742_v9  ;;  %v1933_v23 = vand.u32 4294901760, %v5723_v57  ;;  %v2007_v43 = vand.u32 4294901760, %v2006_v32 }
 0x1ca   :  { %v2013_v13 = vsub.f32 %v5775_v20, %v6362_v26  ;;  %v5828_v46 = vsub.f32 %v5721_v8, %v1930_v55  ;;  %v4591_v26 = vld [vmem:[#allocation5] sm:$0xff] }
 0x1cb   :  { %v5831_v36 = vsub.f32 %v5723_v57, %v1933_v23 }
 0x1cc   :  { %4224 = vmatpush1.bf16.msra.mxu0 %v6483_v29  ;;  %v5729_v29 = vpack.c.bf16 %v1933_v23, %v1930_v55  ;;  %v2014_v24 = vand.u32 4294901760, %v2013_v13 }
 0x1cd   :  { %4226 = vmatprep.subr.bf16.mxu0 %v6484_v38  ;;  %v5731_v38 = vld [vmem:[#allocation10 + $0x40] sm:$0xff] }
 0x1ce   :  { %v5805_v3 = vpack.c.bf16 %v2014_v24, %v2007_v43 }
 0x1d0   :  { %4228 = vmatpush1.bf16.msra.mxu0 %v6485_v54  ;;  %v5733_v54 = vld [vmem:[#allocation10 + $0x48] sm:$0xff] }
 0x1d1   :  { %4230 = vmatprep.subr.bf16.mxu0 %v6486_v21  ;;  %v1936_v21 = vand.u32 4294901760, %v5731_v38 }
 0x1d4   :  { %4232 = vmatpush1.bf16.msra.mxu0 %v6487_v53  ;;  %v1939_v53 = vand.u32 4294901760, %v5733_v54 }
 0x1d5   :  { %4234 = vmatprep.subr.bf16.mxu0 %v6488_v63 }
 0x1d6   :  { %v5739_v63 = vpack.c.bf16 %v1939_v53, %v1936_v21 }
 0x1d8   :  { %4236 = vmatpush1.bf16.msra.mxu0 %v6489_v27  ;;  %v5741_v27 = vld [vmem:[#allocation10 + $0x50] sm:$0xff] }
 0x1d9   :  { %4238 = vmatprep.subr.bf16.mxu0 %v6490_v52  ;;  %v5743_v52 = vld [vmem:[#allocation10 + $0x58] sm:$0xff]  ;;  %v1942_v48 = vand.u32 4294901760, %v5741_v27 }
 0x1da   :  { %v1945_v51 = vand.u32 4294901760, %v5743_v52 }
 0x1dc   :  { %4240 = vmatpush1.bf16.msra.mxu0 %v5447_v47  ;;  %v5715_v47 = vpack.c.bf16 %v1921_v28, %v1918_v40  ;;  %v5753_v60 = vpack.c.bf16 %v1945_v51, %v1942_v48  ;;  %v6357_v40 = vand.u32 4294901760, %v5828_v46  ;;  %v6356_v28 = vand.u32 4294901760, %v5831_v36 }
 0x1de   :  { %4246 = vmatpush3.bf16.msra.mxu1 %v5715_v47  ;;  %v2048_v22 = vsub.f32 %v5828_v46, %v6357_v40  ;;  %v2055_v8 = vsub.f32 %v5831_v36, %v6356_v28 }
 0x1df   :  { %1864 = vmatmul.mubr.f32.vlgmr.msra.gmra.mrb[0].mxu0 %v5336_v12  ;;  %v1899_v12 = vld [vmem:[#allocation10 + $0x20] sm:$0xff]  ;;  %4247 = vmatprep.subr.bf16.mxu1 %v4742_v9 }
 0x1e0   :  { %v1924_v61 = vand.u32 4294901760, %v1899_v12  ;;  %v2049_v57 = vand.u32 4294901760, %v2048_v22  ;;  %v2056_v32 = vand.u32 4294901760, %v2055_v8 }
 0x1e2   :  { %v5719_v6 = vpack.c.bf16 %v1927_v49, %v1924_v61  ;;  %v5813_v18 = vsub.f32 %v1899_v12, %v1924_v61  ;;  %v5841_v61 = vsub.f32 %v5731_v38, %v1936_v21  ;;  %v5844_v49 = vsub.f32 %v5733_v54, %v1939_v53 }
 0x1e3   :  { %v5860_v54 = vsub.f32 %v5741_v27, %v1942_v48  ;;  %v5865_v21 = vsub.f32 %v5743_v52, %v1945_v51  ;;  %v5867_v53 = vpack.c.bf16 %v2056_v32, %v2049_v57  ;;  %v5882_v52 = vsub.f32 %v5755_v19, %v1948_v33 }
 0x1e4   :  { %4249 = vmatpush3.bf16.msra.mxu1 %v5719_v6  ;;  %v6359_v17 = vand.u32 4294901760, %v5813_v18  ;;  %v6355_v55 = vand.u32 4294901760, %v5841_v61  ;;  %v6354_v23 = vand.u32 4294901760, %v5844_v49  ;;  %v5887_v51 = vsub.f32 %v5757_v30, %v1951_v2 }
 0x1e5   :  { %4250 = vmatprep.subr.bf16.mxu1 %v4742_v9  ;;  %v6353_v4 = vand.u32 4294901760, %v5860_v54  ;;  %v6352_v42 = vand.u32 4294901760, %v5865_v21  ;;  %v6351_v16 = vand.u32 4294901760, %v5882_v52  ;;  %v5899_v19 = vsub.f32 %v5769_v34, %v1954_v35 }
 0x1e6   :  { %v2034_v56 = vsub.f32 %v5813_v18, %v6359_v17  ;;  %v2062_v13 = vsub.f32 %v5841_v61, %v6355_v55  ;;  %v2069_v38 = vsub.f32 %v5844_v49, %v6354_v23  ;;  %v5904_v30 = vsub.f32 %v5771_v44, %v1957_v41 }
 0x1e7   :  { %v2076_v27 = vsub.f32 %v5860_v54, %v6353_v4  ;;  %v2083_v48 = vsub.f32 %v5865_v21, %v6352_v42  ;;  %v2090_v22 = vsub.f32 %v5882_v52, %v6351_v16  ;;  %v6349_v8 = vand.u32 4294901760, %v5899_v19 }
 0x1e8   :  { %4252 = vmatpush3.bf16.msra.mxu1 %v5729_v29  ;;  %v2035_v62 = vand.u32 4294901760, %v2034_v56  ;;  %v2063_v43 = vand.u32 4294901760, %v2062_v13  ;;  %v2070_v24 = vand.u32 4294901760, %v2069_v38  ;;  %v6348_v57 = vand.u32 4294901760, %v5904_v30 }
 0x1e9   :  { %4253 = vmatprep.subr.bf16.mxu1 %v4742_v9  ;;  %v2077_v50 = vand.u32 4294901760, %v2076_v27  ;;  %v2084_v56 = vand.u32 4294901760, %v2083_v48  ;;  %v2091_v2 = vand.u32 4294901760, %v2090_v22  ;;  %v2104_v34 = vsub.f32 %v5899_v19, %v6349_v8 }
 0x1ea   :  { %v5835_v12 = vpack.c.bf16 %v2042_v45, %v2035_v62  ;;  %v5871_v37 = vpack.c.bf16 %v2070_v24, %v2063_v43  ;;  %v6350_v62 = vand.u32 4294901760, %v5887_v51  ;;  %v2111_v35 = vsub.f32 %v5904_v30, %v6348_v57 }
 0x1eb   :  { %v5891_v45 = vpack.c.bf16 %v2084_v56, %v2077_v50  ;;  %v2105_v41 = vand.u32 4294901760, %v2104_v34  ;;  %v5923_v43 = vpack.c.bf16 %v5775_v20, %v5773_v25  ;;  %v5927_v24 = vpack.c.bf16 %v5799_v31, %v5797_v1 }
 0x1ec   :  { %4255 = vmatpush3.bf16.msra.mxu1 %v5739_v63  ;;  %v2097_v33 = vsub.f32 %v5887_v51, %v6350_v62  ;;  %v2112_v13 = vand.u32 4294901760, %v2111_v35  ;;  %v5931_v27 = vpack.c.bf16 %v5815_v10, %v5813_v18  ;;  %v5935_v48 = vpack.c.bf16 %v5831_v36, %v5828_v46  ;;  %v1870_v35 = vld [vmem:[%s6246_s4] sm:$0x3] }
 0x1ed   :  { %4256 = vmatprep.subr.bf16.mxu1 %v4742_v9  ;;  %v5939_v50 = vpack.c.bf16 %v5844_v49, %v5841_v61  ;;  %v5943_v56 = vpack.c.bf16 %v5865_v21, %v5860_v54  ;;  %v5947_v22 = vpack.c.bf16 %v5887_v51, %v5882_v52  ;;  %v6525_v25 = vand.u32 4294901760, %v5813_v18 }
 0x1ee   :  { %v2098_v32 = vand.u32 4294901760, %v2097_v33  ;;  %v5919_v38 = vpack.c.bf16 %v2112_v13, %v2105_v41  ;;  %v5951_v33 = vpack.c.bf16 %v5904_v30, %v5899_v19  ;;  %v6529_v18 = vand.u32 4294901760, %v5841_v61 }
 0x1ef   :  { %v6533_v61 = vand.u32 4294901760, %v5882_v52 }
 0x1f0   :  { %4258 = vmatpush3.bf16.msra.mxu1 %v5753_v60  ;;  %v5917_v44 = vpack.c.bf16 %v2098_v32, %v2091_v2  ;;  %v1872_v2 = vlaneseq }
 0x1f1   :  { %4259 = vmatprep.subr.bf16.mxu1 %v4742_v9 }
 0x1f2   :  { %v1873_v32 = vshrl.u32 %v1872_v2, 7 }
 0x1f4   :  { %4261 = vmatpush3.bf16.msra.mxu1 %v5767_v7  ;;  %v1874_v34 = vsub.s32 0, %v1873_v32  ;;  %v1878_v41 = vsub.s32 1, %v1873_v32 }
 0x1f5   :  { %4262 = vmatprep.subr.bf16.mxu1 %v4742_v9 }
 0x1f6   :  { %v1875_v13 = vrot.slane %v1870_v35, %v1874_v34  ;;  %v1879_v57 = vrot.slane %v1870_v35, %v1878_v41 }
 0x1f8   :  { %4264 = vmatpush3.bf16.msra.mxu1 %v5789_v58 }
 0x1f9   :  { %4265 = vmatprep.subr.bf16.mxu1 %v4742_v9 }
 0x2b2   :  { %v1865_v8 = vpop.f32.mrb[0].mxu0 }
 0x2b3   :  { %v1882_v62 = vadd.f32 %v1875_v13, %v1865_v8  ;;  %v1867_v16 = vpop.f32.mrb[1].mxu0 }
 0x2b4   :  { %v1883_v42 = vadd.f32 %v1879_v57, %v1867_v16 }
 0x2b5   :  { %v1884_v4 = vmul.f32 0.5, %v1882_v62 }
 0x2b6   :  { %v1885_v23 = vmul.f32 0.5, %v1883_v42 }
 0x2b7   :  { %4585 = vtanh.f32 %v1884_v4 }
 0x2b8   :  { %4587 = vtanh.f32 %v1885_v23 }
 0x2c1   :  { %v4586_v55 = vpop.eup %4585 }
 0x2c2   :  { %v4588_v28 = vpop.eup %4587  ;;  %v1888_v40 = vmul.f32 0.5, %v4586_v55 }
 0x2c3   :  { %v1889_v2 = vmul.f32 0.5, %v4588_v28 }
 0x2c4   :  { %v1890_v59 = vadd.f32 0.5, %v1888_v40 }
 0x2c5   :  { %v1891_v17 = vadd.f32 0.5, %v1889_v2 }
 0x2c6   :  { %v1892_v11 = vmul.f32 %v1890_v59, %v6521_v14  ;;  %v6523_v14 = vand.u32 4294901760, %v5797_v1  ;;  %v6527_v1 = vand.u32 4294901760, %v5828_v46  ;;  %v6531_v46 = vand.u32 4294901760, %v5860_v54 }
 0x2c7   :  { %v1893_v32 = vmul.f32 %v4591_v26, %v1891_v17  ;;  %v6522_v26 = vand.u32 4294901760, %v5775_v20  ;;  %v6524_v17 = vand.u32 4294901760, %v5799_v31  ;;  %v6526_v20 = vand.u32 4294901760, %v5815_v10 }
 0x2c8   :  { %v6528_v31 = vand.u32 4294901760, %v5831_v36  ;;  %v6530_v10 = vand.u32 4294901760, %v5844_v49  ;;  %v6532_v36 = vand.u32 4294901760, %v5865_v21  ;;  %v6534_v49 = vand.u32 4294901760, %v5887_v51 }
 0x2c9   :  { %v5957_v34 = vadd.f32 %v1893_v32, %v1892_v11  ;;  %v6022_v11 = vpack.c.bf16 %v6522_v26, %v2005_v0  ;;  %v6030_v59 = vpack.c.bf16 %v6524_v17, %v6523_v14  ;;  %v6040_v0 = vpack.c.bf16 %v6526_v20, %v6525_v25 }
 0x2ca   :  { %v6048_v40 = vpack.c.bf16 %v6528_v31, %v6527_v1  ;;  %v6056_v28 = vpack.c.bf16 %v6530_v10, %v6529_v18  ;;  %v6064_v55 = vpack.c.bf16 %v6532_v36, %v6531_v46  ;;  %v6072_v62 = vpack.c.bf16 %v6534_v49, %v6533_v61 }
 0x2cb   :  { %v5960_v8 = vand.u32 4294901760, %v5957_v34  ;;  %v6535_v54 = vand.u32 4294901760, %v5899_v19  ;;  %v6536_v21 = vand.u32 4294901760, %v5904_v30 }
 0x2cd   :  { %v1993_v42 = vsub.f32 %v5957_v34, %v5960_v8  ;;  %v6080_v57 = vpack.c.bf16 %v6536_v21, %v6535_v54 }
 0x2cf   :  { %v1994_v4 = vand.u32 4294901760, %v1993_v42 }
 0x2d1   :  { %v1995_v23 = vsub.f32 %v1993_v42, %v1994_v4 }
 0x2d3   :  { %v1996_v16 = vand.u32 4294901760, %v1995_v23 }
 0x2d5   :  { %3470 = vmatmul.mubr.f32.vlgmr.msra.gmra.mrb[0].mxu1 %v1996_v16 }
 0x2d6   :  { %4267 = vmatpush3.bf16.msra.mxu1 %v5805_v3  ;;  %3504 = vmatprep.mubr.msk.f32.mxu1 %vm4743_vm0, %v6418_v39 }
 0x2d7   :  { %4268 = vmatprep.subr.bf16.mxu1 %v4742_v9 }
 0x2da   :  { %4270 = vmatpush3.bf16.msra.mxu1 %v5819_v5 }
 0x2db   :  { %4271 = vmatprep.subr.bf16.mxu1 %v4742_v9 }
 0x2de   :  { %4273 = vmatpush3.bf16.msra.mxu1 %v5835_v12 }
 0x2df   :  { %4274 = vmatprep.subr.bf16.mxu1 %v4742_v9 }
 0x2e2   :  { %4276 = vmatpush3.bf16.msra.mxu1 %v5867_v53 }
 0x2e3   :  { %4277 = vmatprep.subr.bf16.mxu1 %v4742_v9 }
 0x2e6   :  { %4279 = vmatpush3.bf16.msra.mxu1 %v5871_v37 }
 0x2e7   :  { %4280 = vmatprep.subr.bf16.mxu1 %v4742_v9 }
 0x2ea   :  { %4282 = vmatpush3.bf16.msra.mxu1 %v5891_v45 }
 0x2eb   :  { %4283 = vmatprep.subr.bf16.mxu1 %v4742_v9 }
 0x2ee   :  { %4285 = vmatpush3.bf16.msra.mxu1 %v5917_v44 }
 0x2ef   :  { %4286 = vmatprep.subr.bf16.mxu1 %v4742_v9 }
 0x2f2   :  { %4288 = vmatpush3.bf16.msra.mxu1 %v5919_v38 }
 0x2f3   :  { %4289 = vmatprep.subr.bf16.mxu1 %v4742_v9 }
 0x2f5   :  { %3505 = vmatmul.mubr.f32.vlgmr.msra.gmra.mrb[0].mxu1 %v5960_v8 }
 0x2f6   :  { %4291 = vmatpush3.bf16.msra.mxu1 %v5923_v43  ;;  %3539 = vmatprep.mubr.msk.f32.mxu1 %vm4743_vm0, %v6418_v39 }
 0x2f7   :  { %4292 = vmatprep.subr.bf16.mxu1 %v4742_v9 }
 0x2fa   :  { %4294 = vmatpush3.bf16.msra.mxu1 %v5927_v24 }
 0x2fb   :  { %4295 = vmatprep.subr.bf16.mxu1 %v4742_v9 }
 0x2fe   :  { %4297 = vmatpush3.bf16.msra.mxu1 %v5931_v27 }
 0x2ff   :  { %4298 = vmatprep.subr.bf16.mxu1 %v4742_v9 }
 0x302   :  { %4300 = vmatpush3.bf16.msra.mxu1 %v5935_v48 }
 0x303   :  { %4301 = vmatprep.subr.bf16.mxu1 %v4742_v9 }
 0x306   :  { %4303 = vmatpush3.bf16.msra.mxu1 %v5939_v50 }
 0x307   :  { %4304 = vmatprep.subr.bf16.mxu1 %v4742_v9 }
 0x30a   :  { %4306 = vmatpush3.bf16.msra.mxu1 %v5943_v56 }
 0x30b   :  { %4307 = vmatprep.subr.bf16.mxu1 %v4742_v9 }
 0x30e   :  { %4309 = vmatpush3.bf16.msra.mxu1 %v5947_v22 }
 0x30f   :  { %4310 = vmatprep.subr.bf16.mxu1 %v4742_v9 }
 0x312   :  { %4312 = vmatpush3.bf16.msra.mxu1 %v5951_v33 }
 0x313   :  { %4313 = vmatprep.subr.bf16.mxu1 %v4742_v9 }
 0x315   :  { %3540 = vmatmul.mubr.f32.vlgmr.msra.gmra.mrb[0].mxu1 %v1993_v42 }
 0x316   :  { %4315 = vmatpush3.bf16.msra.mxu1 %v5710_v15  ;;  %3574 = vmatprep.mubr.msk.f32.mxu1 %vm4743_vm0, %v6418_v39 }
 0x317   :  { %4316 = vmatprep.subr.bf16.mxu1 %v4742_v9 }
 0x31a   :  { %4318 = vmatpush3.bf16.msra.mxu1 %v5715_v47 }
 0x31b   :  { %4319 = vmatprep.subr.bf16.mxu1 %v4742_v9 }
 0x31e   :  { %4321 = vmatpush3.bf16.msra.mxu1 %v5719_v6 }
 0x31f   :  { %4322 = vmatprep.subr.bf16.mxu1 %v4742_v9 }
 0x322   :  { %4324 = vmatpush3.bf16.msra.mxu1 %v5729_v29 }
 0x323   :  { %4325 = vmatprep.subr.bf16.mxu1 %v4742_v9 }
 0x326   :  { %4327 = vmatpush3.bf16.msra.mxu1 %v5739_v63 }
 0x327   :  { %4328 = vmatprep.subr.bf16.mxu1 %v4742_v9 }
 0x32a   :  { %4330 = vmatpush3.bf16.msra.mxu1 %v5753_v60 }
 0x32b   :  { %4331 = vmatprep.subr.bf16.mxu1 %v4742_v9 }
 0x32e   :  { %4333 = vmatpush3.bf16.msra.mxu1 %v5767_v7 }
 0x32f   :  { %4334 = vmatprep.subr.bf16.mxu1 %v4742_v9 }
 0x332   :  { %4336 = vmatpush3.bf16.msra.mxu1 %v5789_v58 }
 0x333   :  { %4337 = vmatprep.subr.bf16.mxu1 %v4742_v9 }
 0x335   :  { %3575 = vmatmul.mubr.f32.vlgmr.msra.gmra.mrb[0].mxu1 %v1994_v4 }
 0x336   :  { %4339 = vmatpush3.bf16.msra.mxu1 %v6022_v11  ;;  %3609 = vmatprep.mubr.msk.f32.mxu1 %vm4743_vm0, %v6418_v39 }
 0x337   :  { %4340 = vmatprep.subr.bf16.mxu1 %v4742_v9 }
 0x33a   :  { %4342 = vmatpush3.bf16.msra.mxu1 %v6030_v59 }
 0x33b   :  { %4343 = vmatprep.subr.bf16.mxu1 %v4742_v9 }
 0x33e   :  { %4345 = vmatpush3.bf16.msra.mxu1 %v6040_v0 }
 0x33f   :  { %4346 = vmatprep.subr.bf16.mxu1 %v4742_v9 }
 0x342   :  { %4348 = vmatpush3.bf16.msra.mxu1 %v6048_v40 }
 0x343   :  { %4349 = vmatprep.subr.bf16.mxu1 %v4742_v9 }
 0x346   :  { %4351 = vmatpush3.bf16.msra.mxu1 %v6056_v28 }
 0x347   :  { %4352 = vmatprep.subr.bf16.mxu1 %v4742_v9 }
 0x34a   :  { %4354 = vmatpush3.bf16.msra.mxu1 %v6064_v55 }
 0x34b   :  { %4355 = vmatprep.subr.bf16.mxu1 %v4742_v9 }
 0x34e   :  { %4357 = vmatpush3.bf16.msra.mxu1 %v6072_v62 }
 0x34f   :  { %4358 = vmatprep.subr.bf16.mxu1 %v4742_v9 }
 0x352   :  { %4360 = vmatpush3.bf16.msra.mxu1 %v6080_v57 }
 0x353   :  { %4361 = vmatprep.subr.bf16.mxu1 %v4742_v9 }
 0x355   :  { %3610 = vmatmul.mubr.f32.vlgmr.msra.gmra.mrb[0].mxu1 %v5960_v8 }
 0x356   :  { %4363 = vmatpush3.bf16.msra.mxu1 %v5710_v15  ;;  %3644 = vmatprep.mubr.msk.f32.mxu1 %vm4743_vm0, %v6418_v39 }
 0x357   :  { %4364 = vmatprep.subr.bf16.mxu1 %v4742_v9 }
 0x35a   :  { %4366 = vmatpush3.bf16.msra.mxu1 %v5715_v47 }
 0x35b   :  { %4367 = vmatprep.subr.bf16.mxu1 %v4742_v9 }
 0x35e   :  { %4369 = vmatpush3.bf16.msra.mxu1 %v5719_v6 }
 0x35f   :  { %4370 = vmatprep.subr.bf16.mxu1 %v4742_v9 }
 0x362   :  { %4372 = vmatpush3.bf16.msra.mxu1 %v5729_v29 }
 0x363   :  { %4373 = vmatprep.subr.bf16.mxu1 %v4742_v9 }
 0x366   :  { %4375 = vmatpush3.bf16.msra.mxu1 %v5739_v63 }
 0x367   :  { %4376 = vmatprep.subr.bf16.mxu1 %v4742_v9 }
 0x36a   :  { %4378 = vmatpush3.bf16.msra.mxu1 %v5753_v60 }
 0x36b   :  { %4379 = vmatprep.subr.bf16.mxu1 %v4742_v9 }
 0x36e   :  { %4381 = vmatpush3.bf16.msra.mxu1 %v5767_v7 }
 0x36f   :  { %4382 = vmatprep.subr.bf16.mxu1 %v4742_v9 }
 0x372   :  { %4384 = vmatpush3.bf16.msra.mxu1 %v5789_v58 }
 0x373   :  { %4385 = vmatprep.subr.bf16.mxu1 %v4742_v9 }
 0x375   :  { %3645 = vmatmul.mubr.f32.vlgmr.msra.gmra.mrb[0].mxu1 %v5960_v8 }
 0x376   :  { %4387 = vmatpush3.bf16.msra.mxu1 %v5710_v15  ;;  %3679 = vmatprep.mubr.msk.f32.mxu1 %vm4743_vm0, %v6418_v39 }
 0x377   :  { %4388 = vmatprep.subr.bf16.mxu1 %v4742_v9 }
 0x37a   :  { %4390 = vmatpush3.bf16.msra.mxu1 %v5715_v47 }
 0x37b   :  { %4391 = vmatprep.subr.bf16.mxu1 %v4742_v9 }
 0x37e   :  { %4393 = vmatpush3.bf16.msra.mxu1 %v5719_v6 }
 0x37f   :  { %4394 = vmatprep.subr.bf16.mxu1 %v4742_v9 }
 0x382   :  { %4396 = vmatpush3.bf16.msra.mxu1 %v5729_v29 }
 0x383   :  { %4397 = vmatprep.subr.bf16.mxu1 %v4742_v9 }
 0x386   :  { %4399 = vmatpush3.bf16.msra.mxu1 %v5739_v63 }
 0x387   :  { %4400 = vmatprep.subr.bf16.mxu1 %v4742_v9 }
 0x38a   :  { %4402 = vmatpush3.bf16.msra.mxu1 %v5753_v60 }
 0x38b   :  { %4403 = vmatprep.subr.bf16.mxu1 %v4742_v9 }
 0x38e   :  { %4405 = vmatpush3.bf16.msra.mxu1 %v5767_v7 }
 0x38f   :  { %4406 = vmatprep.subr.bf16.mxu1 %v4742_v9 }
 0x392   :  { %4408 = vmatpush3.bf16.msra.mxu1 %v5789_v58 }
 0x393   :  { %4409 = vmatprep.subr.bf16.mxu1 %v4742_v9 }
 0x448   :  { %v2548_v52 = vpop.f32.mrb[0].mxu1 }
 0x449   :  { %v6124_v51 = vsub.f32 %v5957_v34, %v2548_v52  ;;  %v3646_v19 = vpop.f32.mrb[1].mxu1 }
 0x44b   :  { %v2553_v30 = vmul.f32 %v6124_v51, %v6124_v51 }
 0x44d   :  { %v6128_v35 = vand.u32 4294901760, %v2553_v30 }
 0x44f   :  { %v2636_v41 = vsub.f32 %v2553_v30, %v6128_v35 }
 0x451   :  { %v2637_v13 = vand.u32 4294901760, %v2636_v41 }
 0x453   :  { %v2638_v2 = vsub.f32 %v2636_v41, %v2637_v13 }
 0x455   :  { %v2639_v32 = vand.u32 4294901760, %v2638_v2 }
 0x457   :  { %3680 = vmatmul.mubr.f32.vlgmr.msra.gmra.mrb[2].mxu1 %v2639_v32 }
 0x458   :  { %4411 = vmatpush3.bf16.msra.mxu1 %v5805_v3  ;;  %3714 = vmatprep.mubr.msk.f32.mxu1 %vm4743_vm0, %v6418_v39 }
 0x459   :  { %4412 = vmatprep.subr.bf16.mxu1 %v4742_v9 }
 0x45c   :  { %4414 = vmatpush3.bf16.msra.mxu1 %v5819_v5 }
 0x45d   :  { %4415 = vmatprep.subr.bf16.mxu1 %v4742_v9 }
 0x460   :  { %4417 = vmatpush3.bf16.msra.mxu1 %v5835_v12 }
 0x461   :  { %4418 = vmatprep.subr.bf16.mxu1 %v4742_v9 }
 0x464   :  { %4420 = vmatpush3.bf16.msra.mxu1 %v5867_v53 }
 0x465   :  { %4421 = vmatprep.subr.bf16.mxu1 %v4742_v9 }
 0x468   :  { %4423 = vmatpush3.bf16.msra.mxu1 %v5871_v37 }
 0x469   :  { %4424 = vmatprep.subr.bf16.mxu1 %v4742_v9 }
 0x46c   :  { %4426 = vmatpush3.bf16.msra.mxu1 %v5891_v45 }
 0x46d   :  { %4427 = vmatprep.subr.bf16.mxu1 %v4742_v9 }
 0x470   :  { %4429 = vmatpush3.bf16.msra.mxu1 %v5917_v44 }
 0x471   :  { %4430 = vmatprep.subr.bf16.mxu1 %v4742_v9 }
 0x474   :  { %4432 = vmatpush3.bf16.msra.mxu1 %v5919_v38 }
 0x475   :  { %4433 = vmatprep.subr.bf16.mxu1 %v4742_v9 }
 0x477   :  { %3715 = vmatmul.mubr.f32.vlgmr.msra.gmra.mrb[2].mxu1 %v6128_v35 }
 0x478   :  { %4435 = vmatpush3.bf16.msra.mxu1 %v5923_v43  ;;  %3749 = vmatprep.mubr.msk.f32.mxu1 %vm4743_vm0, %v6418_v39 }
 0x479   :  { %4436 = vmatprep.subr.bf16.mxu1 %v4742_v9 }
 0x47c   :  { %4438 = vmatpush3.bf16.msra.mxu1 %v5927_v24 }
 0x47d   :  { %4439 = vmatprep.subr.bf16.mxu1 %v4742_v9 }
 0x480   :  { %4441 = vmatpush3.bf16.msra.mxu1 %v5931_v27 }
 0x481   :  { %4442 = vmatprep.subr.bf16.mxu1 %v4742_v9 }
 0x484   :  { %4444 = vmatpush3.bf16.msra.mxu1 %v5935_v48 }
 0x485   :  { %4445 = vmatprep.subr.bf16.mxu1 %v4742_v9 }
 0x488   :  { %4447 = vmatpush3.bf16.msra.mxu1 %v5939_v50 }
 0x489   :  { %4448 = vmatprep.subr.bf16.mxu1 %v4742_v9 }
 0x48c   :  { %4450 = vmatpush3.bf16.msra.mxu1 %v5943_v56 }
 0x48d   :  { %4451 = vmatprep.subr.bf16.mxu1 %v4742_v9 }
 0x490   :  { %4453 = vmatpush3.bf16.msra.mxu1 %v5947_v22 }
 0x491   :  { %4454 = vmatprep.subr.bf16.mxu1 %v4742_v9 }
 0x494   :  { %4456 = vmatpush3.bf16.msra.mxu1 %v5951_v33 }
 0x495   :  { %4457 = vmatprep.subr.bf16.mxu1 %v4742_v9 }
 0x497   :  { %3750 = vmatmul.mubr.f32.vlgmr.msra.gmra.mrb[2].mxu1 %v2636_v41 }
 0x498   :  { %4459 = vmatpush3.bf16.msra.mxu1 %v5710_v15  ;;  %3784 = vmatprep.mubr.msk.f32.mxu1 %vm4743_vm0, %v6418_v39 }
 0x499   :  { %4460 = vmatprep.subr.bf16.mxu1 %v4742_v9 }
 0x49c   :  { %4462 = vmatpush3.bf16.msra.mxu1 %v5715_v47 }
 0x49d   :  { %4463 = vmatprep.subr.bf16.mxu1 %v4742_v9 }
 0x4a0   :  { %4465 = vmatpush3.bf16.msra.mxu1 %v5719_v6 }
 0x4a1   :  { %4466 = vmatprep.subr.bf16.mxu1 %v4742_v9 }
 0x4a4   :  { %4468 = vmatpush3.bf16.msra.mxu1 %v5729_v29 }
 0x4a5   :  { %4469 = vmatprep.subr.bf16.mxu1 %v4742_v9 }
 0x4a8   :  { %4471 = vmatpush3.bf16.msra.mxu1 %v5739_v63 }
 0x4a9   :  { %4472 = vmatprep.subr.bf16.mxu1 %v4742_v9 }
 0x4ac   :  { %4474 = vmatpush3.bf16.msra.mxu1 %v5753_v60 }
 0x4ad   :  { %4475 = vmatprep.subr.bf16.mxu1 %v4742_v9 }
 0x4b0   :  { %4477 = vmatpush3.bf16.msra.mxu1 %v5767_v7 }
 0x4b1   :  { %4478 = vmatprep.subr.bf16.mxu1 %v4742_v9 }
 0x4b4   :  { %4480 = vmatpush3.bf16.msra.mxu1 %v5789_v58 }
 0x4b5   :  { %4481 = vmatprep.subr.bf16.mxu1 %v4742_v9 }
 0x4b7   :  { %3785 = vmatmul.mubr.f32.vlgmr.msra.gmra.mrb[2].mxu1 %v2637_v13 }
 0x4b8   :  { %4483 = vmatpush3.bf16.msra.mxu1 %v6022_v11  ;;  %3819 = vmatprep.mubr.msk.f32.mxu1 %vm4743_vm0, %v6418_v39 }
 0x4b9   :  { %4484 = vmatprep.subr.bf16.mxu1 %v4742_v9 }
 0x4bc   :  { %4486 = vmatpush3.bf16.msra.mxu1 %v6030_v59 }
 0x4bd   :  { %4487 = vmatprep.subr.bf16.mxu1 %v4742_v9 }
 0x4c0   :  { %4489 = vmatpush3.bf16.msra.mxu1 %v6040_v0 }
 0x4c1   :  { %4490 = vmatprep.subr.bf16.mxu1 %v4742_v9 }
 0x4c4   :  { %4492 = vmatpush3.bf16.msra.mxu1 %v6048_v40 }
 0x4c5   :  { %4493 = vmatprep.subr.bf16.mxu1 %v4742_v9 }
 0x4c8   :  { %4495 = vmatpush3.bf16.msra.mxu1 %v6056_v28 }
 0x4c9   :  { %4496 = vmatprep.subr.bf16.mxu1 %v4742_v9 }
 0x4cc   :  { %4498 = vmatpush3.bf16.msra.mxu1 %v6064_v55 }
 0x4cd   :  { %4499 = vmatprep.subr.bf16.mxu1 %v4742_v9 }
 0x4d0   :  { %4501 = vmatpush3.bf16.msra.mxu1 %v6072_v62 }
 0x4d1   :  { %4502 = vmatprep.subr.bf16.mxu1 %v4742_v9 }
 0x4d4   :  { %4504 = vmatpush3.bf16.msra.mxu1 %v6080_v57 }
 0x4d5   :  { %4505 = vmatprep.subr.bf16.mxu1 %v4742_v9 }
 0x4d7   :  { %3820 = vmatmul.mubr.f32.vlgmr.msra.gmra.mrb[2].mxu1 %v6128_v35 }
 0x4d8   :  { %4507 = vmatpush3.bf16.msra.mxu1 %v5710_v15  ;;  %3854 = vmatprep.mubr.msk.f32.mxu1 %vm4743_vm0, %v6418_v39 }
 0x4d9   :  { %4508 = vmatprep.subr.bf16.mxu1 %v4742_v9 }
 0x4dc   :  { %4510 = vmatpush3.bf16.msra.mxu1 %v5715_v47 }
 0x4dd   :  { %4511 = vmatprep.subr.bf16.mxu1 %v4742_v9 }
 0x4e0   :  { %4513 = vmatpush3.bf16.msra.mxu1 %v5719_v6 }
 0x4e1   :  { %4514 = vmatprep.subr.bf16.mxu1 %v4742_v9 }
 0x4e4   :  { %4516 = vmatpush3.bf16.msra.mxu1 %v5729_v29  ;;  %v3231_v29 = vld [vmem:[%s6248_s6] ss:$0 sm:$0xff] }
 0x4e5   :  { %4517 = vmatprep.subr.bf16.mxu1 %v4742_v9 }
 0x4e8   :  { %4519 = vmatpush3.bf16.msra.mxu1 %v5739_v63 }
 0x4e9   :  { %4520 = vmatprep.subr.bf16.mxu1 %v4742_v9 }
 0x4ec   :  { %4522 = vmatpush3.bf16.msra.mxu1 %v5753_v60  ;;  %v3232_v60 = vld [vmem:[%s6249_s7] ss:$0 sm:$0xff] }
 0x4ed   :  { %4523 = vmatprep.subr.bf16.mxu1 %v4742_v9 }
 0x4f0   :  { %4525 = vmatpush3.bf16.msra.mxu1 %v5767_v7 }
 0x4f1   :  { %4526 = vmatprep.subr.bf16.mxu1 %v4742_v9 }
 0x4f4   :  { %4528 = vmatpush3.bf16.msra.mxu1 %v5789_v58 }
 0x4f7   :  { %3855 = vmatmul.mubr.f32.vlgmr.msra.gmra.mrb[2].mxu1 %v6128_v35 }
 0x5ca   :  { %v3191_v39 = vpop.f32.mrb[2].mxu1 }
 0x5cb   :  { %v4529_v15 = vadd.f32 1e-05, %v3191_v39  ;;  %v3856_v47 = vpop.f32.mrb[3].mxu1 }
 0x5cd   :  { %4589 = vrsqrt.f32 %v4529_v15 }
 0x5d7   :  { %v4590_v6 = vpop.eup %4589 }
 0x5d8   :  { %v3196_v63 = vmul.f32 %v4590_v6, %v6124_v51 }
 0x5da   :  { %v3204_v9 = vmul.f32 %v3231_v29, %v3196_v63 }
 0x5dc   :  { %v3212_v7 = vadd.f32 %v3232_v60, %v3204_v9 }
 0x5de   :  { %3213 = vst [vmem:[#allocation11] sm:$0xff] %v3212_v7 }
 0x5df   :  { %4713 = shalt.err (!%p4710_p2)
}
 0x5e0   :  { %s4714_s1 = scalar_lea.hbm %s6250_s8, 128 }
 0x5e1   :  { %p4715_p3 = scmp.ne.s32.totalorder %s6250_s8, %s4714_s1  ;;  %p4718_p4 = scmp.lt.u32.totalorder %s4714_s1, %s6250_s8 }
 0x5e3   :  { %p4720_p5 = pnand %p4718_p4, %p4715_p3 }
 0x5e5   :  { %4723 = shalt.err (!%p4720_p5)
}
 0x5e6   :  { %3223 = dma.vmem_to_hbm [thread:$0]  %s3221_s25, 128, %s6250_s8, [#allocation4]  }
 0x5e7   :  { %4730 = dma.done.wait [#allocation4], 128  }
 0x5e8   :  { %4731 = vsyncadd [#allocation4], 4294967168 }
 0x5e9   :  { %3227 = vsyncpa [#allocation3], 1 }
 0x5ea   :  { %3228 = vsyncpa [#allocation6], 1 }
 0x5eb   :  { %3229 = vsyncpa [#allocation9], 1 }
 0x5ec   :  { %3230 = vsyncpa [#allocation4], 1 }

</bundles_post_ra>
